<compile_context>
chip_gen: v5e
topology: v5e:2x2
jax: 0.10.0
libtpu: 0.0.40
codegen_flags: <defaults>
</compile_context>

<pallas_src>
import numpy as np
import jax
import jax.numpy as jnp
from jax.experimental import pallas as pl
from jax.experimental.pallas import tpu as pltpu

_LANE = 128
_SUB = 8


def _round_up(v, m):
    return ((v + m - 1) // m) * m


def _graph_net_kernel(tbl_ref, cnt_ref,                      # scalar-prefetch (SMEM)
                      x_ref, ea_ref, src_ref, dst_ref,
                      w1_ref, b1_ref, wroot_ref, broot_ref, w2_ref, b2_ref,
                      out_ref, agg_ref):
    del tbl_ref                                              # only used by the index_maps
    ni = pl.program_id(0)                                    # node-tile index ("parallel")
    ei = pl.program_id(1)                                    # edge-tile step   ("arbitrary")
    tn = out_ref.shape[0]
    te = ea_ref.shape[0]
    n_pad, f_n = x_ref.shape
    hp = w2_ref.shape[0]
    n_chunks = n_pad // tn

    @pl.when(ei == 0)
    def _init():
        agg_ref[...] = jnp.zeros_like(agg_ref)

    # Edge-tile steps beyond this node tile's CSR range are clamped repeats of its last
    # tile: skip their compute entirely (they would otherwise double-count).
    @pl.when(ei < cnt_ref[ni])
    def _edge_work():
        ea = ea_ref[...]                                     # [tE, Fe]
        src = src_ref[...]                                   # [tE, 1] int32
        dst = dst_ref[...]                                   # [1, tE] int32 (pads -> n_pad)

        # Gather x[src]: node-chunked one-hot matmuls (bounded VMEM footprint).
        def gather_chunk(c, xs):
            row0 = pl.multiple_of(c * tn, _SUB)
            x_chunk = x_ref[pl.ds(row0, tn), :]                          # [tn, Fn]
            oh = (jax.lax.broadcasted_iota(jnp.int32, (te, tn), 1)
                  == (src - c * tn)).astype(jnp.float32)                 # [tE, tn]
            return xs + jnp.dot(oh, x_chunk, preferred_element_type=jnp.float32)

        xs = jax.lax.fori_loop(0, n_chunks, gather_chunk,
                               jnp.zeros((te, f_n), jnp.float32),
                               unroll=n_chunks <= 4)                     # [tE, Fn]

        # Edge-conditioned weights: a single matmul over the lane-blocked [Fe, Fn*Hp] weight.
        ew = jnp.dot(ea, w1_ref[...], preferred_element_type=jnp.float32) + b1_ref[...]

        # Message: m[e, h] = sum_c xs[e, c] * ew[e, c*Hp + h]   (static 128-aligned slices).
        m = xs[:, 0:1] * ew[:, 0:hp]
        for c in range(1, f_n):
            m = m + xs[:, c:c + 1] * ew[:, c * hp:(c + 1) * hp]

        # Scatter-add (aggr='add') into this node tile; base-free iota compare.
        dst_local = dst - ni * tn                                        # [1, tE]
        dst_oh = (jax.lax.broadcasted_iota(jnp.int32, (tn, te), 0)
                  == dst_local).astype(jnp.float32)                      # [tN, tE]
        agg_ref[...] += jnp.dot(dst_oh, m, preferred_element_type=jnp.float32)

    @pl.when(ei == pl.num_programs(1) - 1)
    def _finalize():
        row0 = pl.multiple_of(ni * tn, _SUB)
        x_node = x_ref[pl.ds(row0, tn), :]                               # [tN, Fn]
        h = agg_ref[...]
        h = h + jnp.dot(x_node, wroot_ref[...], preferred_element_type=jnp.float32)
        h = h + broot_ref[...]
        h = jnp.maximum(h, 0.0)
        # Dropout(p=0.6) is identity at inference.
        # TODO(synk): training-mode dropout would need pltpu.prng_seed + stateful_bernoulli.
        out = jnp.dot(h, w2_ref[...], preferred_element_type=jnp.float32) + b2_ref[...]
        out_ref[...] = out.astype(out_ref.dtype)


def regression_graph_net(x, edge_index, edge_attr, params, *, tile_n=256, tile_e=1024):
    """NNConv(add) -> ReLU -> Dropout(eval) -> Linear.

    x: [N, Fn] f32; edge_index: [2, E] int (row0=src, row1=dst); edge_attr: [E, Fe].
    The wrapper builds CSR metadata on the host, so edge_index must be concrete
    (call outside jit, or with a static edge structure).
    """
    n, f_n = x.shape
    e, f_e = edge_attr.shape
    hidden = params["wroot"].shape[1]
    n_out = params["w2"].shape[1]

    hp = _round_up(hidden, _LANE)                 # lane-dense padded hidden
    op = _round_up(n_out, _LANE)                  # lane-dense padded output

    # Node tiling; ensure >= 2 node tiles when possible (v7x megacore sharding).
    tn = _round_up(min(tile_n, _round_up(n, _SUB)), _SUB)
    n_pad = _round_up(n, tn)
    if n_pad // tn < 2 and tn >= 2 * _SUB:
        tn = _round_up(tn // 2, _SUB)
        n_pad = _round_up(n, tn)
    n_tiles_n = n_pad // tn

    # Edge tiling.
    te = min(tile_e, _round_up(max(e, 1), _LANE))
    e_pad = _round_up(max(e, 1), te)
    n_tiles_e = e_pad // te

    # ---- CSR: sort edges by destination (host-side metadata, device-side payload). ----
    src_np = np.asarray(jax.device_get(edge_index[0])).astype(np.int64)
    dst_np = np.asarray(jax.device_get(edge_index[1])).astype(np.int64)
    del src_np
    order = np.argsort(dst_np, kind="stable")
    dst_sorted_np = dst_np[order]

    bounds = np.searchsorted(dst_sorted_np, np.arange(n_tiles_n + 1) * tn, side="left")
    t_start = bounds[:-1] // te
    t_end = -(-bounds[1:] // te)                                   # ceil div
    cnt = np.maximum(t_end - t_start, 0).astype(np.int32)
    max_count = max(int(cnt.max()) if cnt.size else 0, 1)

    tbl = np.zeros((n_tiles_n, max_count), np.int32)
    for i in range(n_tiles_n):
        c = int(cnt[i])
        if c == 0:
            tbl[i, :] = min(int(t_start[i]), n_tiles_e - 1)        # any valid tile; gated off
        else:
            idx = int(t_start[i]) + np.arange(max_count)
            tbl[i, :] = np.minimum(idx, int(t_start[i]) + c - 1)   # clamp repeats (gated off)
    tbl_flat = jnp.asarray(tbl.reshape(-1), jnp.int32)
    cnt_arr = jnp.asarray(cnt, jnp.int32)

    f32 = jnp.float32
    order_j = jnp.asarray(order, jnp.int32)
    src_sorted = jnp.take(edge_index[0].astype(jnp.int32), order_j, axis=0)
    dst_sorted = jnp.take(edge_index[1].astype(jnp.int32), order_j, axis=0)
    ea_sorted = jnp.take(edge_attr.astype(f32), order_j, axis=0)

    x_p = jnp.zeros((n_pad, f_n), f32).at[:n].set(x.astype(f32))
    ea_p = jnp.zeros((e_pad, f_e), f32).at[:e].set(ea_sorted)
    src_p = jnp.zeros((e_pad, 1), jnp.int32).at[:e, 0].set(src_sorted)
    # Sentinel n_pad never matches any node-tile row -> padded edges scatter nothing.
    dst_p = jnp.full((1, e_pad), n_pad, jnp.int32).at[0, :e].set(dst_sorted)

    # NNConv edge-nn weight [Fe, Fn*H] (row-major (c, h)) -> lane-blocked [Fe, Fn*Hp].
    w1_r = params["w1"].reshape(f_e, f_n, hidden)
    w1_p = jnp.zeros((f_e, f_n, hp), f32).at[:, :, :hidden].set(w1_r).reshape(f_e, f_n * hp)
    b1_r = params["b1"].reshape(f_n, hidden)
    b1_p = jnp.zeros((f_n, hp), f32).at[:, :hidden].set(b1_r).reshape(1, f_n * hp)
    wroot_p = jnp.zeros((f_n, hp), f32).at[:, :hidden].set(params["wroot"])
    broot_p = jnp.zeros((1, hp), f32).at[:, :hidden].set(params["broot"])
    w2_p = jnp.zeros((hp, op), f32).at[:hidden, :n_out].set(params["w2"])
    b2_p = jnp.zeros((1, op), f32).at[:, :n_out].set(params["b2"])

    # Generation-aware VMEM budget (v7x: 64 MiB physical -> ~48 MiB; v5e/v6e: up to ~96 MiB).
    try:
        vmem_cap = int(getattr(pltpu.get_tpu_info(), "vmem_capacity_bytes",
                               64 * 1024 * 1024))
    except Exception:
        vmem_cap = 64 * 1024 * 1024
    vmem_limit = max(32 * 1024 * 1024, min(vmem_cap * 3 // 4, 100 * 1024 * 1024))

    maxc = max_count
    edge_map = lambda ni, ei, tbl_r, cnt_r: (tbl_r[ni * maxc + ei], 0)
    dst_map = lambda ni, ei, tbl_r, cnt_r: (0, tbl_r[ni * maxc + ei])
    const_map = lambda ni, ei, tbl_r, cnt_r: (0, 0)

    streamed_edges = int(cnt.sum()) * te                      # edges actually processed
    flops = (2 * streamed_edges * n_pad * f_n                 # chunked gather one-hots
             + 2 * streamed_edges * f_e * f_n * hp            # edge MLP (single matmul)
             + 2 * streamed_edges * f_n * hp                  # message combine (VPU)
             + 2 * streamed_edges * tn * hp                   # scatter one-hot matmul
             + 2 * n_pad * f_n * hp + 2 * n_pad * hp * op)    # root + output linear
    bytes_accessed = (x_p.nbytes + w1_p.nbytes + b1_p.nbytes + wroot_p.nbytes
                      + broot_p.nbytes + w2_p.nbytes + b2_p.nbytes
                      + streamed_edges * (f_e * 4 + 8) + n_pad * op * 4)

    grid_spec = pltpu.PrefetchScalarGridSpec(
        num_scalar_prefetch=2,
        grid=(n_tiles_n, max_count),
        in_specs=[
            pl.BlockSpec((n_pad, f_n), const_map),            # x (resident)
            pl.BlockSpec((te, f_e), edge_map),                # edge_attr tile (CSR-ordered)
            pl.BlockSpec((te, 1), edge_map),                  # src ids tile
            pl.BlockSpec((1, te), dst_map),                   # dst ids tile
            pl.BlockSpec((f_e, f_n * hp), const_map),         # w1 (lane-blocked per channel)
            pl.BlockSpec((1, f_n * hp), const_map),           # b1
            pl.BlockSpec((f_n, hp), const_map),               # wroot
            pl.BlockSpec((1, hp), const_map),                 # broot
            pl.BlockSpec((hp, op), const_map),                # w2
            pl.BlockSpec((1, op), const_map),                 # b2
        ],
        out_specs=pl.BlockSpec((tn, op), lambda ni, ei, tbl_r, cnt_r: (ni, 0)),
        scratch_shapes=[pltpu.VMEM((tn, hp), jnp.float32)],
    )

    out_padded = pl.pallas_call(
        _graph_net_kernel,
        out_shape=jax.ShapeDtypeStruct((n_pad, op), jnp.float32),
        grid_spec=grid_spec,
        compiler_params=pltpu.CompilerParams(
            dimension_semantics=("parallel", "arbitrary"),
            vmem_limit_bytes=int(vmem_limit)),
        cost_estimate=pl.CostEstimate(flops=int(flops), transcendentals=0,
                                      bytes_accessed=int(bytes_accessed)),
    )(tbl_flat, cnt_arr, x_p, ea_p, src_p, dst_p,
      w1_p, b1_p, wroot_p, broot_p, w2_p, b2_p)

    return out_padded[:n, :n_out]


def _reference(x, edge_index, edge_attr, params):
    """Pure-JAX reference of NNConv(add) -> ReLU -> Dropout(eval) -> Linear."""
    src, dst = edge_index[0], edge_index[1]
    f_n = x.shape[1]
    hidden = params["wroot"].shape[1]
    ew = (edge_attr @ params["w1"] + params["b1"]).reshape(-1, f_n, hidden)
    xs = x[src]
    m = jnp.einsum("ec,ech->eh", xs, ew)
    agg = jax.ops.segment_sum(m, dst, num_segments=x.shape[0])
    h = jnp.maximum(agg + x @ params["wroot"] + params["broot"], 0.0)
    return h @ params["w2"] + params["b2"]


def init_params(key, num_node_features, num_edge_features, num_outputs,
                hidden_layer_size=5):
    ks = jax.random.split(key, 6)
    s = 0.1
    return {
        # lin1 of NNConv's edge-nn: Linear(Fe -> Fn * hidden)
        "w1": s * jax.random.normal(
            ks[0], (num_edge_features, num_node_features * hidden_layer_size), jnp.float32),
        "b1": s * jax.random.normal(
            ks[1], (1, num_node_features * hidden_layer_size), jnp.float32),
        # NNConv root weight + bias
        "wroot": s * jax.random.normal(
            ks[2], (num_node_features, hidden_layer_size), jnp.float32),
        "broot": s * jax.random.normal(ks[3], (1, hidden_layer_size), jnp.float32),
        # self.lin1: Linear(hidden -> num_outputs)
        "w2": s * jax.random.normal(
            ks[4], (hidden_layer_size, num_outputs), jnp.float32),
        "b2": s * jax.random.normal(ks[5], (1, num_outputs), jnp.float32),
    }


if __name__ == "__main__":
    num_node_features = 4
    num_edge_features = 3
    num_outputs = 2

    key = jax.random.PRNGKey(0)
    k_p, k_small, k_big = jax.random.split(key, 3)
    params = init_params(k_p, num_node_features, num_edge_features, num_outputs)

    # Small case (single node tile / single edge tile).
    n_nodes, n_edges = 8, 16
    k_x, k_ea, k_src, k_dst = jax.random.split(k_small, 4)
    x = jax.random.normal(k_x, (n_nodes, num_node_features), jnp.float32)
    edge_attr = jax.random.normal(k_ea, (n_edges, num_edge_features), jnp.float32)
    src = jax.random.randint(k_src, (n_edges,), 0, n_nodes, jnp.int32)
    dst = jax.random.randint(k_dst, (n_edges,), 0, n_nodes, jnp.int32)
    edge_index = jnp.stack([src, dst], axis=0)

    out = regression_graph_net(x, edge_index, edge_attr, params)
    jax.block_until_ready(out)
    assert out.shape == (n_nodes, num_outputs)
    ref = _reference(x, edge_index, edge_attr, params)
    assert jnp.allclose(out, ref, atol=1e-4, rtol=1e-4)

    # Larger case: exercises multiple node tiles, CSR edge partitioning, chunked gather
    # and the pl.when(ei < cnt) gating of clamped boundary tiles.
    n_nodes2, n_edges2 = 50, 300
    k_x2, k_ea2, k_src2, k_dst2 = jax.random.split(k_big, 4)
    x2 = jax.random.normal(k_x2, (n_nodes2, num_node_features), jnp.float32)
    edge_attr2 = jax.random.normal(k_ea2, (n_edges2, num_edge_features), jnp.float32)
    src2 = jax.random.randint(k_src2, (n_edges2,), 0, n_nodes2, jnp.int32)
    dst2 = jax.random.randint(k_dst2, (n_edges2,), 0, n_nodes2, jnp.int32)
    edge_index2 = jnp.stack([src2, dst2], axis=0)

    out2 = regression_graph_net(x2, edge_index2, edge_attr2, params,
                                tile_n=16, tile_e=128)
    jax.block_until_ready(out2)
    ref2 = _reference(x2, edge_index2, edge_attr2, params)
    assert jnp.allclose(out2, ref2, atol=1e-4, rtol=1e-4)

    print("KERNEL_OK")
</pallas_src>

<mosaic_0001>
module attributes {stable_mosaic.version = 11 : i64} {
  func.func @_graph_net_kernel(%arg0: i32, %arg1: i32, %arg2: memref<1xi32, #tpu.memory_space<smem>>, %arg3: memref<1xi32, #tpu.memory_space<smem>>, %arg4: memref<8x4xf32, #tpu.memory_space<vmem>>, %arg5: memref<128x3xf32, #tpu.memory_space<vmem>>, %arg6: memref<128x1xi32, #tpu.memory_space<vmem>>, %arg7: memref<1x128xi32, #tpu.memory_space<vmem>>, %arg8: memref<3x512xf32, #tpu.memory_space<vmem>>, %arg9: memref<1x512xf32, #tpu.memory_space<vmem>>, %arg10: memref<4x128xf32, #tpu.memory_space<vmem>>, %arg11: memref<1x128xf32, #tpu.memory_space<vmem>>, %arg12: memref<128x128xf32, #tpu.memory_space<vmem>>, %arg13: memref<1x128xf32, #tpu.memory_space<vmem>>, %arg14: memref<8x128xf32, #tpu.memory_space<vmem>>, %arg15: memref<8x128xf32, #tpu.memory_space<vmem>>) attributes {dimension_semantics = [#tpu.dimension_semantics<parallel>, #tpu.dimension_semantics<arbitrary>], iteration_bounds = array<i64: 1, 1>, scalar_prefetch = 2 : i64, scratch_operands = 1 : i64, tpu.core_type = #tpu.core_type<tc>, window_params = [{pipeline_mode = #tpu.pipeline_mode<synchronous>, transform_indices = @transform_0, window_bounds = array<i64: 8, 4>}, {transform_indices = @transform_1, window_bounds = array<i64: 128, 3>}, {transform_indices = @transform_2, window_bounds = array<i64: 128, 1>}, {transform_indices = @transform_3, window_bounds = array<i64: 1, 128>}, {pipeline_mode = #tpu.pipeline_mode<synchronous>, transform_indices = @transform_4, window_bounds = array<i64: 3, 512>}, {pipeline_mode = #tpu.pipeline_mode<synchronous>, transform_indices = @transform_5, window_bounds = array<i64: 1, 512>}, {pipeline_mode = #tpu.pipeline_mode<synchronous>, transform_indices = @transform_6, window_bounds = array<i64: 4, 128>}, {pipeline_mode = #tpu.pipeline_mode<synchronous>, transform_indices = @transform_7, window_bounds = array<i64: 1, 128>}, {pipeline_mode = #tpu.pipeline_mode<synchronous>, transform_indices = @transform_8, window_bounds = array<i64: 128, 128>}, {pipeline_mode = #tpu.pipeline_mode<synchronous>, transform_indices = @transform_9, window_bounds = array<i64: 1, 128>}, {transform_indices = @transform_10, window_bounds = array<i64: 8, 128>}]} {
    %c0_i32 = arith.constant 0 : i32
    %0 = arith.cmpi eq, %arg1, %c0_i32 : i32
    %1 = arith.extui %0 : i1 to i32
    %c0_i32_0 = arith.constant 0 : i32
    %2 = arith.cmpi ne, %1, %c0_i32_0 : i32
    scf.if %2 {
      %cst = arith.constant 0.000000e+00 : f32
      %11 = vector.broadcast %cst : f32 to vector<8x128xf32>
      %c0 = arith.constant 0 : index
      %c0_4 = arith.constant 0 : index
      %12 = vector.load %arg15[%c0, %c0_4] : memref<8x128xf32, #tpu.memory_space<vmem>>, vector<8x128xf32>
      tpu.vector_store %arg15[%c0, %c0_4], %11 {strides = array<i32>} : memref<8x128xf32, #tpu.memory_space<vmem>>, vector<8x128xf32>,
    } else {
    }
    %3 = arith.index_cast %arg0 : i32 to index
    %4 = memref.load %arg3[%3] : memref<1xi32, #tpu.memory_space<smem>>
    %5 = arith.cmpi slt, %arg1, %4 : i32
    %6 = arith.extui %5 : i1 to i32
    %c0_i32_1 = arith.constant 0 : i32
    %7 = arith.cmpi ne, %6, %c0_i32_1 : i32
    scf.if %7 {
      %c0 = arith.constant 0 : index
      %c0_4 = arith.constant 0 : index
      %11 = vector.load %arg5[%c0, %c0_4] : memref<128x3xf32, #tpu.memory_space<vmem>>, vector<128x3xf32>
      %c0_5 = arith.constant 0 : index
      %c0_6 = arith.constant 0 : index
      %12 = vector.load %arg6[%c0_5, %c0_6] : memref<128x1xi32, #tpu.memory_space<vmem>>, vector<128x1xi32>
      %c0_7 = arith.constant 0 : index
      %c0_8 = arith.constant 0 : index
      %13 = vector.load %arg7[%c0_7, %c0_8] : memref<1x128xi32, #tpu.memory_space<vmem>>, vector<1x128xi32>
      %cst = arith.constant 0.000000e+00 : f32
      %14 = vector.broadcast %cst : f32 to vector<128x4xf32>
      %c0_i32_9 = arith.constant 0 : i32
      %c8_i32 = arith.constant 8 : i32
      %15 = arith.muli %c0_i32_9, %c8_i32 : i32
      %16 = tpu.assume_multiple %15, 8 : i32
      %17 = arith.index_cast %16 : i32 to index
      %c0_10 = arith.constant 0 : index
      %18 = vector.load %arg4[%17, %c0_10] : memref<8x4xf32, #tpu.memory_space<vmem>>, vector<8x4xf32>
      %19 = tpu.iota {dimensions = array<i32: 1>} : vector<128x8xi32>
      %c8_i32_11 = arith.constant 8 : i32
      %20 = arith.muli %c0_i32_9, %c8_i32_11 : i32
      %21 = vector.broadcast %20 : i32 to vector<128x1xi32>
      %22 = arith.subi %12, %21 : vector<128x1xi32>
      %23 = vector.broadcast %22 : vector<128x1xi32> to vector<128x8xi32>
      %24 = arith.cmpi eq, %19, %23 : vector<128x8xi32>
      %25 = arith.extui %24 : vector<128x8xi1> to vector<128x8xi32>
      %26 = arith.sitofp %25 : vector<128x8xi32> to vector<128x8xf32>
      %cst_12 = arith.constant dense<0.000000e+00> : vector<128x4xf32>
      %27 = tpu.matmul %26, %18, %cst_12 {dimension_numbers = #tpu.dot_dimension_numbers<[1], [0], [0], [1], [0, 0, 1, 1], [], []>} : vector<128x8xf32>, vector<8x4xf32>, vector<128x4xf32> -> vector<128x4xf32>
      %28 = arith.addf %14, %27 : vector<128x4xf32>
      %c1_i32 = arith.constant 1 : i32
      %c0_13 = arith.constant 0 : index
      %c0_14 = arith.constant 0 : index
      %29 = vector.load %arg8[%c0_13, %c0_14] : memref<3x512xf32, #tpu.memory_space<vmem>>, vector<3x512xf32>
      %cst_15 = arith.constant dense<0.000000e+00> : vector<128x512xf32>
      %30 = tpu.matmul %11, %29, %cst_15 {dimension_numbers = #tpu.dot_dimension_numbers<[1], [0], [0], [1], [0, 0, 1, 1], [], []>} : vector<128x3xf32>, vector<3x512xf32>, vector<128x512xf32> -> vector<128x512xf32>
      %c0_16 = arith.constant 0 : index
      %c0_17 = arith.constant 0 : index
      %31 = vector.load %arg9[%c0_16, %c0_17] : memref<1x512xf32, #tpu.memory_space<vmem>>, vector<1x512xf32>
      %32 = vector.broadcast %31 : vector<1x512xf32> to vector<128x512xf32>
      %33 = arith.addf %30, %32 : vector<128x512xf32>
      %34 = vector.extract_strided_slice %28 {offsets = [0, 0], sizes = [128, 1], strides = [1, 1]} : vector<128x4xf32> to vector<128x1xf32>
      %35 = vector.extract_strided_slice %33 {offsets = [0, 0], sizes = [128, 128], strides = [1, 1]} : vector<128x512xf32> to vector<128x128xf32>
      %36 = vector.broadcast %34 : vector<128x1xf32> to vector<128x128xf32>
      %37 = arith.mulf %36, %35 : vector<128x128xf32>
      %38 = vector.extract_strided_slice %28 {offsets = [0, 1], sizes = [128, 1], strides = [1, 1]} : vector<128x4xf32> to vector<128x1xf32>
      %39 = vector.extract_strided_slice %33 {offsets = [0, 128], sizes = [128, 128], strides = [1, 1]} : vector<128x512xf32> to vector<128x128xf32>
      %40 = vector.broadcast %38 : vector<128x1xf32> to vector<128x128xf32>
      %41 = arith.mulf %40, %39 : vector<128x128xf32>
      %42 = arith.addf %37, %41 : vector<128x128xf32>
      %43 = vector.extract_strided_slice %28 {offsets = [0, 2], sizes = [128, 1], strides = [1, 1]} : vector<128x4xf32> to vector<128x1xf32>
      %44 = vector.extract_strided_slice %33 {offsets = [0, 256], sizes = [128, 128], strides = [1, 1]} : vector<128x512xf32> to vector<128x128xf32>
      %45 = vector.broadcast %43 : vector<128x1xf32> to vector<128x128xf32>
      %46 = arith.mulf %45, %44 : vector<128x128xf32>
      %47 = arith.addf %42, %46 : vector<128x128xf32>
      %48 = vector.extract_strided_slice %28 {offsets = [0, 3], sizes = [128, 1], strides = [1, 1]} : vector<128x4xf32> to vector<128x1xf32>
      %49 = vector.extract_strided_slice %33 {offsets = [0, 384], sizes = [128, 128], strides = [1, 1]} : vector<128x512xf32> to vector<128x128xf32>
      %50 = vector.broadcast %48 : vector<128x1xf32> to vector<128x128xf32>
      %51 = arith.mulf %50, %49 : vector<128x128xf32>
      %52 = arith.addf %47, %51 : vector<128x128xf32>
      %c8_i32_18 = arith.constant 8 : i32
      %53 = arith.muli %arg0, %c8_i32_18 : i32
      %54 = vector.broadcast %53 : i32 to vector<1x128xi32>
      %55 = arith.subi %13, %54 : vector<1x128xi32>
      %56 = tpu.iota {dimensions = array<i32: 0>} : vector<8x128xi32>
      %57 = vector.broadcast %55 : vector<1x128xi32> to vector<8x128xi32>
      %58 = arith.cmpi eq, %56, %57 : vector<8x128xi32>
      %59 = arith.extui %58 : vector<8x128xi1> to vector<8x128xi32>
      %60 = arith.sitofp %59 : vector<8x128xi32> to vector<8x128xf32>
      %c0_19 = arith.constant 0 : index
      %c0_20 = arith.constant 0 : index
      %61 = vector.load %arg15[%c0_19, %c0_20] : memref<8x128xf32, #tpu.memory_space<vmem>>, vector<8x128xf32>
      %cst_21 = arith.constant dense<0.000000e+00> : vector<8x128xf32>
      %62 = tpu.matmul %60, %52, %cst_21 {dimension_numbers = #tpu.dot_dimension_numbers<[1], [0], [0], [1], [0, 0, 1, 1], [], []>} : vector<8x128xf32>, vector<128x128xf32>, vector<8x128xf32> -> vector<8x128xf32>
      %63 = arith.addf %61, %62 : vector<8x128xf32>
      %c0_22 = arith.constant 0 : index
      %c0_23 = arith.constant 0 : index
      %64 = vector.load %arg15[%c0_22, %c0_23] : memref<8x128xf32, #tpu.memory_space<vmem>>, vector<8x128xf32>
      tpu.vector_store %arg15[%c0_22, %c0_23], %63 {strides = array<i32>} : memref<8x128xf32, #tpu.memory_space<vmem>>, vector<8x128xf32>,
    } else {
    }
    %c0_i32_2 = arith.constant 0 : i32
    %8 = arith.cmpi eq, %arg1, %c0_i32_2 : i32
    %9 = arith.extui %8 : i1 to i32
    %c0_i32_3 = arith.constant 0 : i32
    %10 = arith.cmpi ne, %9, %c0_i32_3 : i32
    scf.if %10 {
      %c8_i32 = arith.constant 8 : i32
      %11 = arith.muli %arg0, %c8_i32 : i32
      %12 = tpu.assume_multiple %11, 8 : i32
      %13 = arith.index_cast %12 : i32 to index
      %c0 = arith.constant 0 : index
      %14 = vector.load %arg4[%13, %c0] : memref<8x4xf32, #tpu.memory_space<vmem>>, vector<8x4xf32>
      %c0_4 = arith.constant 0 : index
      %c0_5 = arith.constant 0 : index
      %15 = vector.load %arg15[%c0_4, %c0_5] : memref<8x128xf32, #tpu.memory_space<vmem>>, vector<8x128xf32>
      %c0_6 = arith.constant 0 : index
      %c0_7 = arith.constant 0 : index
      %16 = vector.load %arg10[%c0_6, %c0_7] : memref<4x128xf32, #tpu.memory_space<vmem>>, vector<4x128xf32>
      %cst = arith.constant dense<0.000000e+00> : vector<8x128xf32>
      %17 = tpu.matmul %14, %16, %cst {dimension_numbers = #tpu.dot_dimension_numbers<[1], [0], [0], [1], [0, 0, 1, 1], [], []>} : vector<8x4xf32>, vector<4x128xf32>, vector<8x128xf32> -> vector<8x128xf32>
      %18 = arith.addf %15, %17 : vector<8x128xf32>
      %c0_8 = arith.constant 0 : index
      %c0_9 = arith.constant 0 : index
      %19 = vector.load %arg11[%c0_8, %c0_9] : memref<1x128xf32, #tpu.memory_space<vmem>>, vector<1x128xf32>
      %20 = vector.broadcast %19 : vector<1x128xf32> to vector<8x128xf32>
      %21 = arith.addf %18, %20 : vector<8x128xf32>
      %cst_10 = arith.constant 0.000000e+00 : f32
      %22 = vector.broadcast %cst_10 : f32 to vector<8x128xf32>
      %23 = arith.maximumf %21, %22 : vector<8x128xf32>
      %c0_11 = arith.constant 0 : index
      %c0_12 = arith.constant 0 : index
      %24 = vector.load %arg12[%c0_11, %c0_12] : memref<128x128xf32, #tpu.memory_space<vmem>>, vector<128x128xf32>
      %cst_13 = arith.constant dense<0.000000e+00> : vector<8x128xf32>
      %25 = tpu.matmul %23, %24, %cst_13 {dimension_numbers = #tpu.dot_dimension_numbers<[1], [0], [0], [1], [0, 0, 1, 1], [], []>} : vector<8x128xf32>, vector<128x128xf32>, vector<8x128xf32> -> vector<8x128xf32>
      %c0_14 = arith.constant 0 : index
      %c0_15 = arith.constant 0 : index
      %26 = vector.load %arg13[%c0_14, %c0_15] : memref<1x128xf32, #tpu.memory_space<vmem>>, vector<1x128xf32>
      %27 = vector.broadcast %26 : vector<1x128xf32> to vector<8x128xf32>
      %28 = arith.addf %25, %27 : vector<8x128xf32>
      %c0_16 = arith.constant 0 : index
      %c0_17 = arith.constant 0 : index
      %29 = vector.load %arg14[%c0_16, %c0_17] : memref<8x128xf32, #tpu.memory_space<vmem>>, vector<8x128xf32>
      tpu.vector_store %arg14[%c0_16, %c0_17], %28 {strides = array<i32>} : memref<8x128xf32, #tpu.memory_space<vmem>>, vector<8x128xf32>,
    } else {
    }
    return
  }
  func.func @transform_0(%arg0: i32, %arg1: i32, %arg2: memref<1xi32, #tpu.memory_space<smem>>, %arg3: memref<1xi32, #tpu.memory_space<smem>>) -> (i32, i32) {
    %c0_i32 = arith.constant 0 : i32
    %c0_i32_0 = arith.constant 0 : i32
    %c0_i32_1 = arith.constant 0 : i32
    return %c0_i32, %c0_i32_0 : i32, i32
  }
  func.func @transform_1(%arg0: i32, %arg1: i32, %arg2: memref<1xi32, #tpu.memory_space<smem>>, %arg3: memref<1xi32, #tpu.memory_space<smem>>) -> (i32, i32) {
    %c1_i32 = arith.constant 1 : i32
    %0 = arith.muli %arg0, %c1_i32 : i32
    %1 = arith.addi %0, %arg1 : i32
    %2 = arith.index_cast %1 : i32 to index
    %3 = memref.load %arg2[%2] : memref<1xi32, #tpu.memory_space<smem>>
    %c0_i32 = arith.constant 0 : i32
    %c0_i32_0 = arith.constant 0 : i32
    return %3, %c0_i32 : i32, i32
  }
  func.func @transform_2(%arg0: i32, %arg1: i32, %arg2: memref<1xi32, #tpu.memory_space<smem>>, %arg3: memref<1xi32, #tpu.memory_space<smem>>) -> (i32, i32) {
    %c1_i32 = arith.constant 1 : i32
    %0 = arith.muli %arg0, %c1_i32 : i32
    %1 = arith.addi %0, %arg1 : i32
    %2 = arith.index_cast %1 : i32 to index
    %3 = memref.load %arg2[%2] : memref<1xi32, #tpu.memory_space<smem>>
    %c0_i32 = arith.constant 0 : i32
    %c0_i32_0 = arith.constant 0 : i32
    return %3, %c0_i32 : i32, i32
  }
  func.func @transform_3(%arg0: i32, %arg1: i32, %arg2: memref<1xi32, #tpu.memory_space<smem>>, %arg3: memref<1xi32, #tpu.memory_space<smem>>) -> (i32, i32) {
    %c1_i32 = arith.constant 1 : i32
    %0 = arith.muli %arg0, %c1_i32 : i32
    %1 = arith.addi %0, %arg1 : i32
    %2 = arith.index_cast %1 : i32 to index
    %3 = memref.load %arg2[%2] : memref<1xi32, #tpu.memory_space<smem>>
    %c0_i32 = arith.constant 0 : i32
    %c0_i32_0 = arith.constant 0 : i32
    return %c0_i32, %3 : i32, i32
  }
  func.func @transform_4(%arg0: i32, %arg1: i32, %arg2: memref<1xi32, #tpu.memory_space<smem>>, %arg3: memref<1xi32, #tpu.memory_space<smem>>) -> (i32, i32) {
    %c0_i32 = arith.constant 0 : i32
    %c0_i32_0 = arith.constant 0 : i32
    %c0_i32_1 = arith.constant 0 : i32
    return %c0_i32, %c0_i32_0 : i32, i32
  }
  func.func @transform_5(%arg0: i32, %arg1: i32, %arg2: memref<1xi32, #tpu.memory_space<smem>>, %arg3: memref<1xi32, #tpu.memory_space<smem>>) -> (i32, i32) {
    %c0_i32 = arith.constant 0 : i32
    %c0_i32_0 = arith.constant 0 : i32
    %c0_i32_1 = arith.constant 0 : i32
    return %c0_i32, %c0_i32_0 : i32, i32
  }
  func.func @transform_6(%arg0: i32, %arg1: i32, %arg2: memref<1xi32, #tpu.memory_space<smem>>, %arg3: memref<1xi32, #tpu.memory_space<smem>>) -> (i32, i32) {
    %c0_i32 = arith.constant 0 : i32
    %c0_i32_0 = arith.constant 0 : i32
    %c0_i32_1 = arith.constant 0 : i32
    return %c0_i32, %c0_i32_0 : i32, i32
  }
  func.func @transform_7(%arg0: i32, %arg1: i32, %arg2: memref<1xi32, #tpu.memory_space<smem>>, %arg3: memref<1xi32, #tpu.memory_space<smem>>) -> (i32, i32) {
    %c0_i32 = arith.constant 0 : i32
    %c0_i32_0 = arith.constant 0 : i32
    %c0_i32_1 = arith.constant 0 : i32
    return %c0_i32, %c0_i32_0 : i32, i32
  }
  func.func @transform_8(%arg0: i32, %arg1: i32, %arg2: memref<1xi32, #tpu.memory_space<smem>>, %arg3: memref<1xi32, #tpu.memory_space<smem>>) -> (i32, i32) {
    %c0_i32 = arith.constant 0 : i32
    %c0_i32_0 = arith.constant 0 : i32
    %c0_i32_1 = arith.constant 0 : i32
    return %c0_i32, %c0_i32_0 : i32, i32
  }
  func.func @transform_9(%arg0: i32, %arg1: i32, %arg2: memref<1xi32, #tpu.memory_space<smem>>, %arg3: memref<1xi32, #tpu.memory_space<smem>>) -> (i32, i32) {
    %c0_i32 = arith.constant 0 : i32
    %c0_i32_0 = arith.constant 0 : i32
    %c0_i32_1 = arith.constant 0 : i32
    return %c0_i32, %c0_i32_0 : i32, i32
  }
  func.func @transform_10(%arg0: i32, %arg1: i32, %arg2: memref<1xi32, #tpu.memory_space<smem>>, %arg3: memref<1xi32, #tpu.memory_space<smem>>) -> (i32, i32) {
    %c0_i32 = arith.constant 0 : i32
    %c0_i32_0 = arith.constant 0 : i32
    return %arg0, %c0_i32 : i32, i32
  }
}

</mosaic_0001>

<bundles_post_ra>
// kernel: tpu_custom_call.1
= control target key start
LH: loop header
LB: loop body
LE: loop exit
PB: predicated region body
PF: predicated region fallthrough
CT: control target
= control target key end

     0   :  { %19 = vsyncpa [#allocation7], 0  ;;  %v1435_v0 = vmov 0.0   ;;  %s2183_s0 = inlined_call_operand.<no memory space> [shape: s32[1], index: 0, kind: input, shape index: {}]   ;;  %s2184_s1 = inlined_call_operand.<no memory space> [shape: s32[1], index: 1, kind: input, shape index: {}]   ;;  %s2185_s2 = inlined_call_operand.vmem [shape: f32[8,4], index: 2, kind: input, shape index: {}]   ;;  %s2186_s3 = inlined_call_operand.vmem [shape: f32[128,3], index: 3, kind: input, shape index: {}]   ;;  %s2187_s4 = inlined_call_operand.vmem [shape: s32[128,1], index: 4, kind: input, shape index: {}]   ;;  %s2188_s5 = inlined_call_operand.vmem [shape: s32[1,128], index: 5, kind: input, shape index: {}]   ;;  %s2189_s6 = inlined_call_operand.vmem [shape: f32[3,512], index: 6, kind: input, shape index: {}]   ;;  %s2190_s7 = inlined_call_operand.vmem [shape: f32[1,512], index: 7, kind: input, shape index: {}]   ;;  %s2191_s8 = inlined_call_operand.vmem [shape: f32[4,128], index: 8, kind: input, shape index: {}]   ;;  %s2192_s9 = inlined_call_operand.vmem [shape: f32[1,128], index: 9, kind: input, shape index: {}]   ;;  %s2193_s10 = inlined_call_operand.vmem [shape: f32[128,128], index: 10, kind: input, shape index: {}]   ;;  %s2194_s11 = inlined_call_operand.vmem [shape: f32[1,128], index: 11, kind: input, shape index: {}]   ;;  %s2195_s12 = inlined_call_operand.hbm [shape: f32[8,128], index: 12, kind: output, shape index: {}]  }
   0x1   :  { %s1239_s23 = sshll.u32 %s2183_s0, 4  ;;  %p108_p0 = scmp.lt.s32.totalorder %s2183_s0, 0  ;;  %117 = vst [vmem:[#allocation2] sm:$0xff] %v1435_v0 }
   0x2   :  { %p89_p1 = scmp.lt.s32.totalorder %s1239_s23, 15  ;;  %p1244_p2 = scmp.le.s32.totalorder %s2184_s1, 0 }
   0x3   :  { %s2225_s0 = smov (!%p108_p0, %s2183_s0), 0 }
   0x4   :  { %s2227_s23 = smov (!%p89_p1, %s1239_s23), 15  ;;  %s110_s30 = scalar_lea.vmem %s2188_s5, %s2225_s0 }
   0x5   :  { %s1240_s13 = sshll.u32 %s2227_s23, 3  ;;  %122 = sbr.rel (%p1244_p2) target bundleno = 715 (0x2cb), region = 49 }
   0x6   :  { %s1526_s16 = scalar_lea.vmem %s2186_s3, %s1240_s13  ;;  %s1531_s19 = scalar_lea.vmem %s2187_s4, %s1240_s13 }
   0xa   :  { %v151_v1 = vld [vmem:[%s1531_s19 + $0x60] sm:$0xff]  ;;  %v146_v2 = vld [vmem:[%s1531_s19 + $0x38] sm:$0xff]  ;;  %v145_v3 = vld [vmem:[%s1531_s19 + $0x30] sm:$0xff]  ;;  %v2203_v4 = vmov 0   ;;  %v2196_v22 = vlaneseq  ;;  %vm255_vm0 = vcmask 64512   ;;  %v1437_v27 = vmov 0.0  }
   0xb   :  { %1362 = vset.pattern.permute.xlu2 %v2203_v4  ;;  %1361 = vset.pattern.permute.xlu1 %v2203_v4  ;;  %v147_v5 = vld [vmem:[%s1531_s19 + $0x40] sm:$0xff]  ;;  %v150_v6 = vld [vmem:[%s1531_s19 + $0x58] sm:$0xff]  ;;  %v148_v8 = vld [vmem:[%s1531_s19 + $0x48] sm:$0xff]  ;;  %vm439_vm6 = vcmask 1042432   ;;  %vm390_vm8 = vcmask 23552  }
   0xc   :  { %1360 = vset.pattern.permute.xlu0 %v2203_v4  ;;  %196 = vperm.xlu2 %1362, %v151_v1   ;;  %v139_v7 = vld [vmem:[%s1531_s19] sm:$0xff]  ;;  %v140_v9 = vld [vmem:[%s1531_s19 + $0x8] sm:$0xff]  ;;  %v149_v11 = vld [vmem:[%s1531_s19 + $0x50] sm:$0xff]  ;;  %v1559_v23 = vand.u32 127, %v2196_v22 }
   0xd   :  { %181 = vperm.xlu1 %1361, %v146_v2   ;;  %178 = vperm.xlu0 %1360, %v145_v3   ;;  %v152_v10 = vld [vmem:[%s1531_s19 + $0x68] sm:$0xff]  ;;  %v141_v12 = vld [vmem:[%s1531_s19 + $0x10] sm:$0xff]  ;;  %v142_v15 = vld [vmem:[%s1531_s19 + $0x18] sm:$0xff] }
   0xe   :  { %v153_v13 = vld [vmem:[%s1531_s19 + $0x70] sm:$0xff]  ;;  %v144_v14 = vld [vmem:[%s1531_s19 + $0x28] sm:$0xff]  ;;  %v154_v16 = vld [vmem:[%s1531_s19 + $0x78] sm:$0xff] }
   0xf   :  { %v143_v17 = vld [vmem:[%s1531_s19 + $0x20] sm:$0xff]  ;;  %v370_v39 = vld [vmem:[%s2189_s6 + $0x8] sm:$0x77]  ;;  %v125_v54 = vld [vmem:[%s1526_s16 + $0x10] sm:$0xff] }
  0x10   :  { %v156_v18 = vld [vmem:[%s2185_s2] sm:$0xff]  ;;  %385 = vst [vmem:[#allocation1 + $0x10] ss:$2 sm:$0xff] %v370_v39  ;;  %v124_v48 = vld [vmem:[%s1526_s16 + $0x8] sm:$0xff]  ;;  %v126_v60 = vld [vmem:[%s1526_s16 + $0x18] sm:$0xff] }
  0x11   :  { %1350 = vmatpush.msra.mxu2 %v156_v18  ;;  %319 = vmatpush.msra.mxu0 %v156_v18  ;;  %v369_v29 = vld [vmem:[%s2189_s6] sm:$0x77]  ;;  %v128_v1 = vld [vmem:[%s1526_s16 + $0x28] sm:$0xff]  ;;  %v129_v2 = vld [vmem:[%s1526_s16 + $0x30] sm:$0xff] }
  0x12   :  { %1349 = vmatpush.msra.mxu1 %v156_v18  ;;  %1351 = vmatpush.msra.mxu3 %v156_v18  ;;  %383 = vst [vmem:[#allocation1] ss:$2 sm:$0xff] %v369_v29  ;;  %v123_v40 = vld [vmem:[%s1526_s16] sm:$0xff]  ;;  %v130_v3 = vld [vmem:[%s1526_s16 + $0x38] sm:$0xff] }
  0x13   :  { %v127_v0 = vld [vmem:[%s1526_s16 + $0x20] sm:$0xff] }
  0x14   :  { %184 = vperm.xlu2 %1362, %v147_v5   ;;  %v131_v5 = vld [vmem:[%s1526_s16 + $0x40] sm:$0xff] }
  0x15   :  { %193 = vperm.xlu0 %1360, %v150_v6   ;;  %160 = vperm.xlu1 %1361, %v139_v7   ;;  %v132_v6 = vld [vmem:[%s1526_s16 + $0x48] sm:$0xff]  ;;  %v133_v7 = vld [vmem:[%s1526_s16 + $0x50] sm:$0xff] }
  0x17   :  { %v389_v46 = vld.sshfl [vmem:[#allocation1 + $0x18] sm:$0xff pattern:$0x75316420]  ;;  %v388_v47 = vld.sshfl [vmem:[#allocation1 + $0x10] sm:$0xff pattern:$0x75316420] }
  0x18   :  { %1328 = vmatpush.msk.msrb.mxu0 %vm439_vm6, %v389_v46  ;;  %1311 = vmatpush.msk.msrb.mxu3 %vm439_vm6, %v388_v47 }
  0x19   :  { %v387_v37 = vld.sshfl [vmem:[#allocation1 + $0x8] sm:$0xff pattern:$0x75316420]  ;;  %v386_v38 = vld.sshfl [vmem:[#allocation1] sm:$0xff pattern:$0x75316420] }
  0x1a   :  { %1294 = vmatpush.msk.msrb.mxu2 %vm439_vm6, %v387_v37  ;;  %1277 = vmatpush.msk.msrb.mxu1 %vm439_vm6, %v386_v38 }
  0x1c   :  { %187 = vperm.xlu2 %1362, %v148_v8   ;;  %v134_v8 = vld [vmem:[%s1526_s16 + $0x58] sm:$0xff] }
  0x1d   :  { %163 = vperm.xlu0 %1360, %v140_v9   ;;  %199 = vperm.xlu1 %1361, %v152_v10   ;;  %v2197_v9 = vmov 1   ;;  %v135_v10 = vld [vmem:[%s1526_s16 + $0x60] sm:$0xff] }
  0x24   :  { %190 = vperm.xlu2 %1362, %v149_v11   ;;  %v136_v11 = vld [vmem:[%s1526_s16 + $0x68] sm:$0xff] }
  0x25   :  { %166 = vperm.xlu0 %1360, %v141_v12   ;;  %202 = vperm.xlu1 %1361, %v153_v13  }
  0x2c   :  { %175 = vperm.xlu2 %1362, %v144_v14  }
  0x2d   :  { %169 = vperm.xlu0 %1360, %v142_v15   ;;  %205 = vperm.xlu1 %1361, %v154_v16  }
  0x34   :  { %1363 = vset.pattern.permute.xlu2 %v2197_v9 }
  0x35   :  { %172 = vperm.xlu0 %1360, %v143_v17  }
  0x66   :  { %v197_v19 = vpop.permute.xlu2 %196 }
  0x67   :  { %vm219_vm9 = vcmp.eq.s32.totalorder %v1559_v23, %v197_v19 }
  0x68   :  { %v1257_v45 = vsel %vm219_vm9, 1.0, %v1437_v27 }
  0x6e   :  { %v185_v20 = vpop.permute.xlu2 %184 }
  0x6f   :  { %vm215_vm7 = vcmp.eq.s32.totalorder %v1559_v23, %v185_v20 }
  0x70   :  { %v1253_v43 = vsel %vm215_vm7, 1.0, %v1437_v27 }
  0x76   :  { %v188_v21 = vpop.permute.xlu2 %187 }
  0x77   :  { %vm216_vm11 = vcmp.eq.s32.totalorder %v1559_v23, %v188_v21 }
  0x78   :  { %v1254_v50 = vsel %vm216_vm11, 1.0, %v1437_v27 }
  0x7e   :  { %v1561_v24 = vpop.permute.xlu2 %190 }
  0x7f   :  { %v182_v25 = vpop.permute.xlu1 %181  ;;  %v179_v26 = vpop.permute.xlu0 %178  ;;  %vm217_vm14 = vcmp.eq.s32.totalorder %v1559_v23, %v1561_v24  ;;  %v2199_v24 = vmov 3  }
  0x80   :  { %vm213_vm1 = vcmp.eq.s32.totalorder %v1559_v23, %v179_v26  ;;  %vm214_vm2 = vcmp.eq.s32.totalorder %v1559_v23, %v182_v25  ;;  %v1255_v56 = vsel %vm217_vm14, 1.0, %v1437_v27  ;;  %v137_v25 = vld [vmem:[%s1526_s16 + $0x70] sm:$0xff] }
  0x81   :  { %v1251_v28 = vsel %vm213_vm1, 1.0, %v1437_v27  ;;  %v1252_v33 = vsel %vm214_vm2, 1.0, %v1437_v27 }
  0x82   :  { %1267 = vmatmul.msk.f32.vlgmr.msra.gmra.mxu2 %vm255_vm0, %v1251_v28 }
  0x86   :  { %v176_v30 = vpop.permute.xlu2 %175 }
  0x87   :  { %v194_v31 = vpop.permute.xlu0 %193  ;;  %vm212_vm3 = vcmp.eq.s32.totalorder %v1559_v23, %v176_v30  ;;  %v161_v32 = vpop.permute.xlu1 %160 }
  0x88   :  { %vm218_vm4 = vcmp.eq.s32.totalorder %v1559_v23, %v194_v31  ;;  %v1250_v34 = vsel %vm212_vm3, 1.0, %v1437_v27  ;;  %vm207_vm5 = vcmp.eq.s32.totalorder %v1559_v23, %v161_v32 }
  0x89   :  { %v1256_v35 = vsel %vm218_vm4, 1.0, %v1437_v27  ;;  %v1245_v36 = vsel %vm207_vm5, 1.0, %v1437_v27  ;;  %1266 = vmatmul.msk.f32.vlgmr.msra.gmra.mxu1 %vm255_vm0, %v1250_v34 }
  0x8a   :  { %1261 = vmatmul.msk.f32.vlgmr.msra.gmra.mxu0 %vm255_vm0, %v1245_v36  ;;  %1268 = vmatmul.msk.f32.gmra.mxu2 %vm255_vm0, %v1252_v33 }
  0x8b   :  { %1272 = vmatmul.msk.f32.vlgmr.msra.gmra.mxu3 %vm255_vm0, %v1256_v35 }
  0x8f   :  { %v164_v41 = vpop.permute.xlu0 %163  ;;  %v200_v42 = vpop.permute.xlu1 %199 }
  0x90   :  { %vm208_vm10 = vcmp.eq.s32.totalorder %v1559_v23, %v164_v41  ;;  %vm220_vm12 = vcmp.eq.s32.totalorder %v1559_v23, %v200_v42 }
  0x91   :  { %v1246_v44 = vsel %vm208_vm10, 1.0, %v1437_v27  ;;  %1278 = vmatmul.msk.f32.vlgmr.msrb.gmra.mxu1 %vm390_vm8, %v123_v40  ;;  %v1258_v52 = vsel %vm220_vm12, 1.0, %v1437_v27 }
  0x92   :  { %1262 = vmatmul.msk.f32.gmra.mxu0 %vm255_vm0, %v1246_v44  ;;  %1269 = vmatmul.msk.f32.gmra.mxu2 %vm255_vm0, %v1253_v43 }
  0x93   :  { %1273 = vmatmul.msk.f32.gmra.mxu3 %vm255_vm0, %v1257_v45  ;;  %v138_v45 = vld [vmem:[%s1526_s16 + $0x78] sm:$0xff] }
  0x97   :  { %v167_v49 = vpop.permute.xlu0 %166  ;;  %v203_v53 = vpop.permute.xlu1 %202 }
  0x98   :  { %vm209_vm13 = vcmp.eq.s32.totalorder %v1559_v23, %v167_v49  ;;  %vm221_vm15 = vcmp.eq.s32.totalorder %v1559_v23, %v203_v53 }
  0x99   :  { %v1247_v51 = vsel %vm209_vm13, 1.0, %v1437_v27  ;;  %1279 = vmatmul.msk.f32.gmra.mxu1 %vm390_vm8, %v124_v48  ;;  %v1259_v58 = vsel %vm221_vm15, 1.0, %v1437_v27 }
  0x9a   :  { %1263 = vmatmul.msk.f32.gmra.mxu0 %vm255_vm0, %v1247_v51  ;;  %1270 = vmatmul.msk.f32.gmra.mxu2 %vm255_vm0, %v1254_v50 }
  0x9b   :  { %1274 = vmatmul.msk.f32.gmra.mxu3 %vm255_vm0, %v1258_v52 }
  0x9f   :  { %v170_v55 = vpop.permute.xlu0 %169  ;;  %v206_v59 = vpop.permute.xlu1 %205 }
  0xa0   :  { %vm210_vm1 = vcmp.eq.s32.totalorder %v1559_v23, %v170_v55  ;;  %vm222_vm2 = vcmp.eq.s32.totalorder %v1559_v23, %v206_v59 }
  0xa1   :  { %v1248_v57 = vsel %vm210_vm1, 1.0, %v1437_v27  ;;  %1280 = vmatmul.msk.f32.gmra.mxu1 %vm390_vm8, %v125_v54  ;;  %v1260_v63 = vsel %vm222_vm2, 1.0, %v1437_v27 }
  0xa2   :  { %1264 = vmatmul.msk.f32.gmra.mxu0 %vm255_vm0, %v1248_v57  ;;  %1271 = vmatmul.msk.f32.gmra.mxu2 %vm255_vm0, %v1255_v56  ;;  %v1815_v57 = vld [vmem:[%s2190_s7] sm:$0xf] }
  0xa3   :  { %1275 = vmatmul.msk.f32.gmra.mxu3 %vm255_vm0, %v1259_v58  ;;  %v1821_v59 = vperm.slane %v1815_v57, 1 }
  0xa7   :  { %v173_v61 = vpop.permute.xlu0 %172 }
  0xa8   :  { %vm211_vm3 = vcmp.eq.s32.totalorder %v1559_v23, %v173_v61  ;;  %v2201_v23 = vmov 2  }
  0xa9   :  { %v1249_v62 = vsel %vm211_vm3, 1.0, %v1437_v27  ;;  %1281 = vmatmul.msk.f32.gmra.mxu1 %vm390_vm8, %v126_v60 }
  0xaa   :  { %1265 = vmatmul.msk.f32.gmra.mxu0 %vm255_vm0, %v1249_v62  ;;  %1295 = vmatmul.msk.f32.vlgmr.msrb.gmra.mxu2 %vm390_vm8, %v123_v40 }
  0xab   :  { %1276 = vmatmul.msk.f32.gmra.mxu3 %vm255_vm0, %v1260_v63 }
  0xb1   :  { %1282 = vmatmul.msk.f32.gmra.mxu1 %vm390_vm8, %v127_v0 }
  0xb2   :  { %1296 = vmatmul.msk.f32.gmra.mxu2 %vm390_vm8, %v124_v48  ;;  %1329 = vmatmul.msk.f32.vlgmr.msrb.gmra.mxu0 %vm390_vm8, %v123_v40 }
  0xb3   :  { %1312 = vmatmul.msk.f32.vlgmr.msrb.gmra.mxu3 %vm390_vm8, %v123_v40 }
  0xb9   :  { %1283 = vmatmul.msk.f32.gmra.mxu1 %vm390_vm8, %v128_v1 }
  0xba   :  { %1297 = vmatmul.msk.f32.gmra.mxu2 %vm390_vm8, %v125_v54  ;;  %1330 = vmatmul.msk.f32.gmra.mxu0 %vm390_vm8, %v124_v48 }
  0xbb   :  { %1313 = vmatmul.msk.f32.gmra.mxu3 %vm390_vm8, %v124_v48 }
  0xc1   :  { %1284 = vmatmul.msk.f32.gmra.mxu1 %vm390_vm8, %v129_v2 }
  0xc2   :  { %1298 = vmatmul.msk.f32.gmra.mxu2 %vm390_vm8, %v126_v60  ;;  %1331 = vmatmul.msk.f32.gmra.mxu0 %vm390_vm8, %v125_v54 }
  0xc3   :  { %1314 = vmatmul.msk.f32.gmra.mxu3 %vm390_vm8, %v125_v54 }
  0xc9   :  { %1285 = vmatmul.msk.f32.gmra.mxu1 %vm390_vm8, %v130_v3 }
  0xca   :  { %1299 = vmatmul.msk.f32.gmra.mxu2 %vm390_vm8, %v127_v0  ;;  %1332 = vmatmul.msk.f32.gmra.mxu0 %vm390_vm8, %v126_v60 }
  0xcb   :  { %1315 = vmatmul.msk.f32.gmra.mxu3 %vm390_vm8, %v126_v60 }
  0xd1   :  { %1286 = vmatmul.msk.f32.gmra.mxu1 %vm390_vm8, %v131_v5 }
  0xd2   :  { %1300 = vmatmul.msk.f32.gmra.mxu2 %vm390_vm8, %v128_v1  ;;  %1333 = vmatmul.msk.f32.gmra.mxu0 %vm390_vm8, %v127_v0 }
  0xd3   :  { %1316 = vmatmul.msk.f32.gmra.mxu3 %vm390_vm8, %v127_v0 }
  0xd9   :  { %1287 = vmatmul.msk.f32.gmra.mxu1 %vm390_vm8, %v132_v6 }
  0xda   :  { %1301 = vmatmul.msk.f32.gmra.mxu2 %vm390_vm8, %v129_v2  ;;  %1334 = vmatmul.msk.f32.gmra.mxu0 %vm390_vm8, %v128_v1 }
  0xdb   :  { %1317 = vmatmul.msk.f32.gmra.mxu3 %vm390_vm8, %v128_v1 }
  0xe1   :  { %1288 = vmatmul.msk.f32.gmra.mxu1 %vm390_vm8, %v133_v7 }
  0xe2   :  { %1302 = vmatmul.msk.f32.gmra.mxu2 %vm390_vm8, %v130_v3  ;;  %1335 = vmatmul.msk.f32.gmra.mxu0 %vm390_vm8, %v129_v2 }
  0xe3   :  { %1318 = vmatmul.msk.f32.gmra.mxu3 %vm390_vm8, %v129_v2 }
  0xe9   :  { %1289 = vmatmul.msk.f32.gmra.mxu1 %vm390_vm8, %v134_v8 }
  0xea   :  { %1303 = vmatmul.msk.f32.gmra.mxu2 %vm390_vm8, %v131_v5  ;;  %1336 = vmatmul.msk.f32.gmra.mxu0 %vm390_vm8, %v130_v3 }
  0xeb   :  { %1319 = vmatmul.msk.f32.gmra.mxu3 %vm390_vm8, %v130_v3 }
  0xf1   :  { %1290 = vmatmul.msk.f32.gmra.mxu1 %vm390_vm8, %v135_v10 }
  0xf2   :  { %1304 = vmatmul.msk.f32.gmra.mxu2 %vm390_vm8, %v132_v6  ;;  %1337 = vmatmul.msk.f32.gmra.mxu0 %vm390_vm8, %v131_v5 }
  0xf3   :  { %1320 = vmatmul.msk.f32.gmra.mxu3 %vm390_vm8, %v131_v5 }
  0xf9   :  { %1291 = vmatmul.msk.f32.gmra.mxu1 %vm390_vm8, %v136_v11 }
  0xfa   :  { %1305 = vmatmul.msk.f32.gmra.mxu2 %vm390_vm8, %v133_v7  ;;  %1338 = vmatmul.msk.f32.gmra.mxu0 %vm390_vm8, %v132_v6 }
  0xfb   :  { %1321 = vmatmul.msk.f32.gmra.mxu3 %vm390_vm8, %v132_v6 }
 0x101   :  { %1292 = vmatmul.msk.f32.gmra.mxu1 %vm390_vm8, %v137_v25 }
 0x102   :  { %1306 = vmatmul.msk.f32.gmra.mxu2 %vm390_vm8, %v134_v8  ;;  %1339 = vmatmul.msk.f32.gmra.mxu0 %vm390_vm8, %v133_v7 }
 0x103   :  { %1322 = vmatmul.msk.f32.gmra.mxu3 %vm390_vm8, %v133_v7 }
 0x105   :  { %v339_v12 = vpop.f32.mrf.mxu2 }
 0x106   :  { %v1685_v13 = vpop.f32.mrf.mxu1 }
 0x107   :  { %v1687_v14 = vpop.f32.mrf.mxu0  ;;  %735 = vperm.xlu0 %1360, %v1685_v13  }
 0x108   :  { %805 = vperm.xlu2 %1363, %v1687_v14   ;;  %710 = vperm.xlu1 %1361, %v1687_v14  }
 0x109   :  { %1293 = vmatmul.msk.f32.gmra.mxu1 %vm390_vm8, %v138_v45 }
 0x10a   :  { %1340 = vmatmul.msk.f32.gmra.mxu0 %vm390_vm8, %v134_v8  ;;  %1307 = vmatmul.msk.f32.gmra.mxu2 %vm390_vm8, %v135_v10 }
 0x10b   :  { %1323 = vmatmul.msk.f32.gmra.mxu3 %vm390_vm8, %v134_v8 }
 0x10d   :  { %v1695_v15 = vpop.f32.mrf.mxu2 }
 0x10e   :  { %v354_v16 = vpop.f32.mrf.mxu3  ;;  %v1702_v18 = vpop.f32.mrf.mxu1 }
 0x10f   :  { %v1697_v17 = vpop.f32.mrf.mxu0  ;;  %765 = vperm.xlu0 %1360, %v354_v16  }
 0x110   :  { %825 = vperm.xlu2 %1363, %v1685_v13   ;;  %740 = vperm.xlu1 %1361, %v339_v12  }
 0x112   :  { %1341 = vmatmul.msk.f32.gmra.mxu0 %vm390_vm8, %v135_v10  ;;  %1308 = vmatmul.msk.f32.gmra.mxu2 %vm390_vm8, %v136_v11 }
 0x113   :  { %1324 = vmatmul.msk.f32.gmra.mxu3 %vm390_vm8, %v135_v10 }
 0x115   :  { %v1705_v19 = vpop.f32.mrf.mxu2 }
 0x116   :  { %v1707_v20 = vpop.f32.mrf.mxu3  ;;  %v1720_v27 = vpop.f32.mrf.mxu1 }
 0x117   :  { %v1709_v21 = vpop.f32.mrf.mxu0  ;;  %1365 = vset.pattern.permute.xlu0 %v2197_v9 }
 0x118   :  { %1364 = vset.pattern.permute.xlu2 %v2201_v23  ;;  %1368 = vset.pattern.permute.xlu1 %v2199_v24 }
 0x119   :  { %829 = vperm.xlu0 %1365, %v339_v12   ;;  %921 = vperm.xlu2 %1364, %v1685_v13  }
 0x11a   :  { %1041 = vperm.xlu1 %1368, %v354_v16   ;;  %1342 = vmatmul.msk.f32.gmra.mxu0 %vm390_vm8, %v136_v11 }
 0x11b   :  { %1325 = vmatmul.msk.f32.gmra.mxu3 %vm390_vm8, %v136_v11  ;;  %1309 = vmatmul.msk.f32.gmra.mxu2 %vm390_vm8, %v137_v25  ;;  %v1848_v11 = vperm.slane %v1815_v57, 2 }
 0x11d   :  { %v1718_v26 = vpop.f32.mrf.mxu2 }
 0x11e   :  { %v1724_v28 = vpop.f32.mrf.mxu3  ;;  %v1738_v33 = vpop.f32.mrf.mxu1 }
 0x11f   :  { %v1726_v29 = vpop.f32.mrf.mxu0 }
 0x121   :  { %1367 = vset.pattern.permute.xlu0 %v2201_v23  ;;  %1366 = vset.pattern.permute.xlu2 %v2197_v9 }
 0x122   :  { %1021 = vperm.xlu1 %1368, %v339_v12   ;;  %945 = vperm.xlu0 %1367, %v354_v16  }
 0x123   :  { %849 = vperm.xlu2 %1366, %v354_v16   ;;  %1326 = vmatmul.msk.f32.gmra.mxu3 %vm390_vm8, %v137_v25 }
 0x124   :  { %1343 = vmatmul.msk.f32.gmra.mxu0 %vm390_vm8, %v137_v25  ;;  %1310 = vmatmul.msk.f32.gmra.mxu2 %vm390_vm8, %v138_v45 }
 0x125   :  { %v1732_v30 = vpop.f32.mrf.mxu2 }
 0x126   :  { %v1734_v31 = vpop.f32.mrf.mxu3  ;;  %v1748_v37 = vpop.f32.mrf.mxu1 }
 0x127   :  { %v1736_v32 = vpop.f32.mrf.mxu0 }
 0x12a   :  { %1371 = vset.pattern.permute.xlu1 %v2203_v4  ;;  %925 = vperm.xlu0 %1367, %v339_v12  }
 0x12b   :  { %1369 = vset.pattern.permute.xlu2 %v2203_v4  ;;  %770 = vperm.xlu1 %1371, %v1707_v20  }
 0x12c   :  { %715 = vperm.xlu2 %1369, %v1697_v17   ;;  %1344 = vmatmul.msk.f32.gmra.mxu0 %vm390_vm8, %v138_v45 }
 0x12d   :  { %v530_v34 = vpop.f32.mrf.mxu2  ;;  %1327 = vmatmul.msk.f32.gmra.mxu3 %vm390_vm8, %v138_v45 }
 0x12e   :  { %v1744_v35 = vpop.f32.mrf.mxu3  ;;  %v1762_v41 = vpop.f32.mrf.mxu1  ;;  %v531_v62 = vadd.f32 %v530_v34, %v1821_v59  ;;  %v1865_v34 = vperm.slane %v1815_v57, 0 }
 0x12f   :  { %v1746_v36 = vpop.f32.mrf.mxu0 }
 0x130   :  { %2205 = vst [vmem:[#allocation9_spill] sm:$0xff] %v1746_v36  ;;  %v2214_v36 = vmov 0  }
 0x132   :  { %1370 = vset.pattern.permute.xlu0 %v2197_v9 }
 0x133   :  { %1372 = vset.pattern.permute.xlu1 %v2197_v9  ;;  %809 = vperm.xlu0 %1370, %v1697_v17  }
 0x134   :  { %833 = vperm.xlu1 %1372, %v1695_v15   ;;  %745 = vperm.xlu2 %1369, %v1695_v15  }
 0x135   :  { %v1755_v38 = vpop.f32.mrf.mxu2 }
 0x136   :  { %v1757_v39 = vpop.f32.mrf.mxu3  ;;  %v1784_v47 = vpop.f32.mrf.mxu1 }
 0x137   :  { %v1759_v40 = vpop.f32.mrf.mxu0 }
 0x138   :  { %2206 = vst [vmem:[#allocation10_spill] sm:$0xff] %v1759_v40 }
 0x13b   :  { %853 = vperm.xlu0 %1370, %v1707_v20  }
 0x13c   :  { %1373 = vset.pattern.permute.xlu1 %v2201_v23  ;;  %775 = vperm.xlu2 %1369, %v1724_v28  }
 0x13d   :  { %949 = vperm.xlu1 %1373, %v1707_v20   ;;  %v1767_v42 = vpop.f32.mrf.mxu2 }
 0x13e   :  { %v1769_v43 = vpop.f32.mrf.mxu3  ;;  %v1803_v53 = vpop.f32.mrf.mxu1 }
 0x13f   :  { %v1771_v44 = vpop.f32.mrf.mxu0 }
 0x140   :  { %2207 = vst [vmem:[#allocation11_spill] sm:$0xff] %v1771_v44 }
 0x143   :  { %1377 = vset.pattern.permute.xlu0 %v2203_v4 }
 0x144   :  { %1379 = vset.pattern.permute.xlu2 %v2197_v9  ;;  %720 = vperm.xlu0 %1377, %v1709_v21  }
 0x145   :  { %1374 = vset.pattern.permute.xlu1 %v2199_v24  ;;  %837 = vperm.xlu2 %1379, %v1705_v19   ;;  %v1782_v46 = vpop.f32.mrf.mxu2 }
 0x146   :  { %1045 = vperm.xlu1 %1374, %v1707_v20   ;;  %v1787_v48 = vpop.f32.mrf.mxu3  ;;  %v1818_v58 = vpop.f32.mrf.mxu1 }
 0x147   :  { %2208 = vst [vmem:[#allocation12_spill] sm:$0xff] %v1787_v48  ;;  %v1790_v49 = vpop.f32.mrf.mxu0 }
 0x148   :  { %2209 = vst [vmem:[#allocation13_spill] sm:$0xff] %v1790_v49 }
 0x14c   :  { %750 = vperm.xlu0 %1377, %v1705_v19  }
 0x14d   :  { %1381 = vset.pattern.permute.xlu2 %v2199_v24  ;;  %v1794_v50 = vpop.f32.mrf.mxu2 }
 0x14e   :  { %1375 = vset.pattern.permute.xlu1 %v2201_v23  ;;  %1049 = vperm.xlu2 %1381, %v1724_v28   ;;  %v1798_v51 = vpop.f32.mrf.mxu3  ;;  %v1834_v2 = vpop.f32.mrf.mxu1 }
 0x14f   :  { %929 = vperm.xlu1 %1375, %v1695_v15   ;;  %v1801_v52 = vpop.f32.mrf.mxu0 }
 0x154   :  { %780 = vperm.xlu0 %1377, %v1734_v31  }
 0x155   :  { %v545_v54 = vpop.f32.mrf.mxu2 }
 0x156   :  { %1029 = vperm.xlu2 %1381, %v1705_v19   ;;  %v1807_v55 = vpop.f32.mrf.mxu3  ;;  %v546_v6 = vadd.f32 %v545_v54, %v1821_v59 }
 0x157   :  { %1376 = vset.pattern.permute.xlu1 %v2199_v24  ;;  %v1810_v56 = vpop.f32.mrf.mxu0 }
 0x158   :  { %1025 = vperm.xlu1 %1376, %v1695_v15   ;;  %v1853_v15 = vpop.f32.mrf.mxu1 }
 0x15c   :  { %1384 = vset.pattern.permute.xlu0 %v2197_v9 }
 0x15d   :  { %841 = vperm.xlu0 %1384, %v1718_v26   ;;  %v1825_v60 = vpop.f32.mrf.mxu2 }
 0x15e   :  { %1383 = vset.pattern.permute.xlu2 %v2197_v9  ;;  %v610_v61 = vpop.f32.mrf.mxu3 }
 0x15f   :  { %817 = vperm.xlu2 %1383, %v1726_v29   ;;  %v1830_v63 = vpop.f32.mrf.mxu0  ;;  %v611_v20 = vadd.f32 %v610_v61, %v1848_v11  ;;  %v481_v61 = vadd.f32 %v1784_v47, %v1865_v34 }
 0x160   :  { %1378 = vset.pattern.permute.xlu1 %v2197_v9 }
 0x161   :  { %813 = vperm.xlu1 %1378, %v1709_v21  }
 0x162   :  { %v806_v0 = vpop.permute.xlu2 %805 }
 0x163   :  { %v868_v1 = vmul.f32 %v806_v0, %v531_v62 }
 0x165   :  { %861 = vperm.xlu0 %1384, %v1734_v31   ;;  %v1837_v3 = vpop.f32.mrf.mxu2 }
 0x166   :  { %v1839_v5 = vpop.f32.mrf.mxu3 }
 0x167   :  { %1385 = vset.pattern.permute.xlu2 %v2201_v23  ;;  %v1843_v7 = vpop.f32.mrf.mxu0 }
 0x168   :  { %957 = vperm.xlu2 %1385, %v1734_v31  }
 0x169   :  { %857 = vperm.xlu1 %1378, %v1724_v28  }
 0x16a   :  { %v826_v8 = vpop.permute.xlu2 %825 }
 0x16b   :  { %v873_v10 = vmul.f32 %v826_v8, %v546_v6  ;;  %v1877_v6 = vpop.f32.mrf.mxu1 }
 0x16d   :  { %1397 = vset.pattern.permute.xlu0 %v2199_v24  ;;  %v1851_v12 = vpop.f32.mrf.mxu2 }
 0x16e   :  { %1057 = vperm.xlu0 %1397, %v1744_v35   ;;  %v1856_v16 = vpop.f32.mrf.mxu3 }
 0x16f   :  { %v1862_v25 = vpop.f32.mrf.mxu0 }
 0x170   :  { %1386 = vset.pattern.permute.xlu2 %v2199_v24 }
 0x171   :  { %1380 = vset.pattern.permute.xlu1 %v2201_v23  ;;  %1053 = vperm.xlu2 %1386, %v1734_v31   ;;  %v466_v31 = vadd.f32 %v1702_v18, %v1865_v34 }
 0x172   :  { %953 = vperm.xlu1 %1380, %v1724_v28  }
 0x173   :  { %v922_v45 = vpop.permute.xlu2 %921 }
 0x174   :  { %v969_v54 = vmul.f32 %v922_v45, %v611_v20 }
 0x175   :  { %v1868_v62 = vpop.f32.mrf.mxu2 }
 0x176   :  { %1017 = vperm.xlu0 %1397, %v1685_v13   ;;  %v1873_v0 = vpop.f32.mrf.mxu3 }
 0x177   :  { %v1882_v45 = vpop.f32.mrf.mxu0 }
 0x178   :  { %2210 = vst [vmem:[#allocation14_spill] sm:$0xff] %v1882_v45 }
 0x179   :  { %1387 = vset.pattern.permute.xlu2 %v2201_v23  ;;  %v736_v8 = vpop.permute.xlu0 %735 }
 0x17a   :  { %933 = vperm.xlu1 %1380, %v1705_v19   ;;  %937 = vperm.xlu2 %1387, %v1718_v26   ;;  %v793_v28 = vmul.f32 %v736_v8, %v481_v61  ;;  %v711_v20 = vpop.permute.xlu1 %710  ;;  %v484_v19 = vadd.f32 %v1803_v53, %v1865_v34  ;;  %v498_v61 = vpop.f32.mrf.mxu1 }
 0x17b   :  { %v788_v47 = vmul.f32 %v711_v20, %v466_v31  ;;  %v2211_v31 = vmov 3  }
 0x17c   :  { %v889_v13 = vadd.f32 %v873_v10, %v793_v28  ;;  %v469_v10 = vadd.f32 %v1720_v27, %v1865_v34  ;;  %v549_v27 = vadd.f32 %v1825_v60, %v1821_v59  ;;  %v1917_v60 = vperm.slane %v1815_v57, 3 }
 0x17d   :  { %v1884_v22 = vadd.f32 %v868_v1, %v788_v47  ;;  %v850_v9 = vpop.permute.xlu2 %849  ;;  %v1886_v24 = vpop.f32.mrf.mxu2 }
 0x17e   :  { %1037 = vperm.xlu0 %1397, %v1732_v30   ;;  %v1889_v18 = vpop.f32.mrf.mxu3  ;;  %v1891_v23 = vadd.f32 %v969_v54, %v889_v13  ;;  %v499_v54 = vadd.f32 %v498_v61, %v1865_v34  ;;  %v487_v61 = vadd.f32 %v1818_v58, %v1865_v34 }
 0x17f   :  { %v1902_v20 = vpop.f32.mrf.mxu0 }
 0x180   :  { %2212 = vst [vmem:[#allocation15_spill] sm:$0xff] %v1902_v20 }
 0x181   :  { %v766_v8 = vpop.permute.xlu0 %765 }
 0x182   :  { %1382 = vset.pattern.permute.xlu1 %v2203_v4  ;;  %1388 = vset.pattern.permute.xlu2 %v2211_v31  ;;  %v741_v1 = vpop.permute.xlu1 %740  ;;  %v2213_v4 = vmov 2   ;;  %v799_v48 = vmul.f32 %v766_v8, %v499_v54  ;;  %v2215_v54 = vmov 1  }
 0x183   :  { %725 = vperm.xlu1 %1382, %v1726_v29   ;;  %1033 = vperm.xlu2 %1388, %v1718_v26   ;;  %v794_v28 = vmul.f32 %v741_v1, %v484_v19 }
 0x185   :  { %v563_v53 = vpop.f32.mrf.mxu2 }
 0x186   :  { %v716_v47 = vpop.permute.xlu2 %715  ;;  %v564_v13 = vadd.f32 %v563_v53, %v1821_v59  ;;  %1401 = vset.pattern.permute.xlu0 %v2213_v4  ;;  %v1906_v40 = vpop.f32.mrf.mxu3 }
 0x187   :  { %v789_v44 = vmul.f32 %v716_v47, %v469_v10  ;;  %905 = vperm.xlu0 %1401, %v1697_v17  }
 0x188   :  { %v879_v19 = vmul.f32 %v850_v9, %v564_v13 }
 0x18a   :  { %v895_v1 = vadd.f32 %v879_v19, %v799_v48  ;;  %v693_v48 = vpop.f32.mrf.mxu0 }
 0x18b   :  { %755 = vperm.xlu1 %1382, %v1718_v26   ;;  %1389 = vset.pattern.permute.xlu2 %v2214_v36  ;;  %v830_v53 = vpop.permute.xlu0 %829  ;;  %v679_v26 = vadd.f32 %v1830_v63, %v1917_v60  ;;  %v694_v8 = vadd.f32 %v693_v48, %v1917_v60 }
 0x18c   :  { %v874_v45 = vmul.f32 %v830_v53, %v549_v27  ;;  %730 = vperm.xlu2 %1389, %v1736_v32   ;;  %v1042_v10 = vpop.permute.xlu1 %1041 }
 0x18d   :  { %v1071_v27 = vmul.f32 %v1042_v10, %v694_v8  ;;  %v534_v8 = vadd.f32 %v1755_v38, %v1821_v59  ;;  %v501_v38 = vpop.f32.mrf.mxu1 }
 0x18e   :  { %v890_v47 = vadd.f32 %v874_v45, %v794_v28  ;;  %v746_v20 = vpop.permute.xlu2 %745  ;;  %v628_v49 = vpop.f32.mrf.mxu3 }
 0x18f   :  { %v795_v9 = vmul.f32 %v746_v20, %v487_v61  ;;  %1405 = vset.pattern.permute.xlu0 %v2211_v31  ;;  %v629_v58 = vadd.f32 %v628_v49, %v1848_v11  ;;  %v614_v49 = vadd.f32 %v1839_v5, %v1848_v11  ;;  %v555_v61 = vadd.f32 %v1851_v12, %v1821_v59 }
 0x190   :  { %v552_v12 = vadd.f32 %v1837_v3, %v1821_v59 }
 0x193   :  { %1390 = vset.pattern.permute.xlu1 %v2215_v54 }
 0x194   :  { %821 = vperm.xlu1 %1390, %v1736_v32   ;;  %1391 = vset.pattern.permute.xlu2 %v2213_v4  ;;  %v1022_v45 = vpop.permute.xlu1 %1021  ;;  %v946_v57 = vpop.permute.xlu0 %945 }
 0x195   :  { %v1066_v28 = vmul.f32 %v1022_v45, %v679_v26  ;;  %v975_v20 = vmul.f32 %v946_v57, %v629_v58  ;;  %917 = vperm.xlu2 %1391, %v1736_v32  }
 0x196   :  { %v1928_v13 = vpop.permute.xlu2 %775  ;;  %v631_v3 = vpop.f32.mrf.mxu3 }
 0x197   :  { %v991_v63 = vadd.f32 %v975_v20, %v895_v1 }
 0x199   :  { %v1932_v19 = vadd.f32 %v1071_v27, %v991_v63 }
 0x19c   :  { %1393 = vset.pattern.permute.xlu1 %v2214_v36  ;;  %v926_v53 = vpop.permute.xlu0 %925 }
 0x19d   :  { %v970_v48 = vmul.f32 %v926_v53, %v614_v49  ;;  %1392 = vset.pattern.permute.xlu2 %v2214_v36  ;;  %785 = vperm.xlu1 %1393, %v1744_v35   ;;  %v771_v26 = vpop.permute.xlu1 %770  ;;  %v502_v49 = vadd.f32 %v501_v38, %v1865_v34  ;;  %v685_v53 = vadd.f32 %v1862_v25, %v1917_v60 }
 0x19e   :  { %760 = vperm.xlu2 %1392, %v1732_v30   ;;  %v472_v25 = vadd.f32 %v1738_v33, %v1865_v34  ;;  %v490_v33 = vadd.f32 %v1834_v2, %v1865_v34 }
 0x19f   :  { %v986_v1 = vadd.f32 %v970_v48, %v890_v47  ;;  %v838_v10 = vpop.permute.xlu2 %837 }
 0x1a0   :  { %v876_v58 = vmul.f32 %v838_v10, %v555_v61 }
 0x1a1   :  { %v1940_v5 = vadd.f32 %v1066_v28, %v986_v1  ;;  %v566_v28 = vpop.f32.mrf.mxu2  ;;  %v800_v1 = vmul.f32 %v771_v26, %v502_v49  ;;  %v696_v26 = vpop.f32.mrf.mxu0 }
 0x1a2   :  { %v567_v61 = vadd.f32 %v566_v28, %v1821_v59 }
 0x1a5   :  { %1394 = vset.pattern.permute.xlu1 %v2215_v54  ;;  %v810_v45 = vpop.permute.xlu0 %809 }
 0x1a6   :  { %v869_v36 = vmul.f32 %v810_v45, %v534_v8  ;;  %1395 = vset.pattern.permute.xlu2 %v2215_v54  ;;  %845 = vperm.xlu1 %1394, %v1732_v30   ;;  %v834_v57 = vpop.permute.xlu1 %833  ;;  %v632_v54 = vadd.f32 %v631_v3, %v1848_v11 }
 0x1a7   :  { %v875_v47 = vmul.f32 %v834_v57, %v552_v12  ;;  %865 = vperm.xlu2 %1395, %v1744_v35   ;;  %v697_v57 = vadd.f32 %v696_v26, %v1917_v60 }
 0x1a8   :  { %v1950_v20 = vadd.f32 %v869_v36, %v789_v44  ;;  %v1952_v27 = vpop.permute.xlu2 %1049 }
 0x1a9   :  { %v891_v63 = vadd.f32 %v875_v47, %v795_v9  ;;  %v540_v47 = vadd.f32 %v1782_v46, %v1821_v59  ;;  %v617_v46 = vadd.f32 %v1856_v16, %v1848_v11  ;;  %v569_v26 = vpop.f32.mrf.mxu2 }
 0x1ad   :  { %v854_v48 = vpop.permute.xlu0 %853 }
 0x1ae   :  { %v880_v10 = vmul.f32 %v854_v48, %v567_v61  ;;  %1396 = vset.pattern.permute.xlu1 %v2213_v4 }
 0x1af   :  { %1398 = vset.pattern.permute.xlu2 %v2211_v31  ;;  %961 = vperm.xlu1 %1396, %v1744_v35   ;;  %v950_v44 = vpop.permute.xlu1 %949 }
 0x1b0   :  { %v896_v9 = vadd.f32 %v880_v10, %v800_v1  ;;  %v976_v8 = vmul.f32 %v950_v44, %v632_v54  ;;  %v1030_v12 = vpop.permute.xlu2 %1029  ;;  %1013 = vperm.xlu2 %1398, %v1736_v32  }
 0x1b1   :  { %v1963_v45 = vmul.f32 %v1030_v12, %v685_v53 }
 0x1b2   :  { %v992_v36 = vadd.f32 %v976_v8, %v896_v9  ;;  %v682_v9 = vadd.f32 %v1843_v7, %v1917_v60  ;;  %v537_v7 = vadd.f32 %v1767_v42, %v1821_v59 }
 0x1b6   :  { %v721_v28 = vpop.permute.xlu0 %720 }
 0x1b7   :  { %v790_v35 = vmul.f32 %v721_v28, %v472_v25  ;;  %913 = vperm.xlu1 %1396, %v1726_v29  }
 0x1b8   :  { %1399 = vset.pattern.permute.xlu2 %v2213_v4  ;;  %v1046_v38 = vpop.permute.xlu1 %1045 }
 0x1b9   :  { %v1072_v32 = vmul.f32 %v1046_v38, %v697_v57  ;;  %v818_v3 = vpop.permute.xlu2 %817  ;;  %941 = vperm.xlu2 %1399, %v1732_v30  }
 0x1ba   :  { %v1973_v49 = vmul.f32 %v818_v3, %v540_v47  ;;  %v699_v3 = vpop.f32.mrf.mxu0 }
 0x1bb   :  { %v1977_v61 = vadd.f32 %v1072_v32, %v992_v36  ;;  %v504_v36 = vpop.f32.mrf.mxu1 }
 0x1bc   :  { %v505_v47 = vadd.f32 %v504_v36, %v1865_v34 }
 0x1be   :  { %v751_v54 = vpop.permute.xlu0 %750  ;;  %v801_v42 = vmul.f32 %v1928_v13, %v505_v47 }
 0x1bf   :  { %v796_v53 = vmul.f32 %v751_v54, %v490_v33  ;;  %909 = vperm.xlu1 %1396, %v1709_v21   ;;  %v634_v33 = vpop.f32.mrf.mxu3 }
 0x1c1   :  { %v892_v48 = vadd.f32 %v876_v58, %v796_v53  ;;  %1400 = vset.pattern.permute.xlu2 %v2211_v31  ;;  %v930_v1 = vpop.permute.xlu1 %929 }
 0x1c2   :  { %v971_v10 = vmul.f32 %v930_v1, %v617_v46  ;;  %v1983_v30 = vpop.permute.xlu2 %957  ;;  %1009 = vperm.xlu2 %1400, %v1726_v29   ;;  %v700_v46 = vadd.f32 %v699_v3, %v1917_v60 }
 0x1c4   :  { %v987_v44 = vadd.f32 %v971_v10, %v891_v63  ;;  %v676_v10 = vadd.f32 %v1810_v56, %v1917_v60  ;;  %v1073_v13 = vmul.f32 %v1952_v27, %v700_v46  ;;  %v475_v27 = vadd.f32 %v1748_v37, %v1865_v34 }
 0x1c5   :  { %v543_v37 = vadd.f32 %v1794_v50, %v1821_v59 }
 0x1c6   :  { %v1986_v2 = vpop.permute.xlu0 %780 }
 0x1c7   :  { %1402 = vset.pattern.permute.xlu1 %v2211_v31  ;;  %v637_v50 = vpop.f32.mrf.mxu3 }
 0x1c8   :  { %1005 = vperm.xlu1 %1402, %v1709_v21  }
 0x1ca   :  { %1403 = vset.pattern.permute.xlu2 %v2213_v4  ;;  %v1026_v16 = vpop.permute.xlu1 %1025 }
 0x1cb   :  { %v1067_v58 = vmul.f32 %v1026_v16, %v682_v9  ;;  %v1993_v8 = vpop.permute.xlu2 %1053  ;;  %901 = vperm.xlu2 %1403, %v1687_v14   ;;  %v620_v16 = vadd.f32 %v1873_v0, %v1848_v11 }
 0x1cd   :  { %v1996_v12 = vadd.f32 %v1067_v58, %v987_v44 }
 0x1cf   :  { %v1998_v29 = vpop.permute.xlu0 %841 }
 0x1d0   :  { %1001 = vperm.xlu1 %1402, %v1697_v17   ;;  %v570_v17 = vadd.f32 %v569_v26, %v1821_v59 }
 0x1d3   :  { %1404 = vset.pattern.permute.xlu2 %v2211_v31  ;;  %v814_v21 = vpop.permute.xlu1 %813 }
 0x1d4   :  { %v870_v63 = vmul.f32 %v814_v21, %v537_v7  ;;  %v2004_v4 = vpop.permute.xlu2 %937  ;;  %997 = vperm.xlu2 %1404, %v1687_v14  }
 0x1d6   :  { %v2007_v25 = vadd.f32 %v870_v63, %v790_v35  ;;  %v635_v35 = vadd.f32 %v634_v33, %v1848_v11 }
 0x1d7   :  { %v2009_v57 = vpop.permute.xlu0 %861 }
 0x1db   :  { %v858_v28 = vpop.permute.xlu1 %857 }
 0x1dc   :  { %v881_v31 = vmul.f32 %v858_v28, %v570_v17 }
 0x1dd   :  { %v2014_v38 = vpop.permute.xlu2 %1033 }
 0x1de   :  { %v897_v32 = vadd.f32 %v881_v31, %v801_v42  ;;  %v599_v42 = vadd.f32 %v1769_v43, %v1848_v11  ;;  %v608_v43 = vadd.f32 %v1807_v55, %v1848_v11 }
 0x1e0   :  { %v2016_v14 = vpop.permute.xlu0 %1057 }
 0x1e4   :  { %v954_v54 = vpop.permute.xlu1 %953 }
 0x1e5   :  { %v977_v53 = vmul.f32 %v954_v54, %v635_v35  ;;  %v478_v35 = vadd.f32 %v1762_v41, %v1865_v34  ;;  %v507_v41 = vpop.f32.mrf.mxu1 }
 0x1e6   :  { %v731_v1 = vpop.permute.xlu2 %730 }
 0x1e7   :  { %v993_v44 = vadd.f32 %v977_v53, %v897_v32  ;;  %v673_v53 = vadd.f32 %v1801_v52, %v1917_v60  ;;  %v508_v52 = vadd.f32 %v507_v41, %v1865_v34 }
 0x1e8   :  { %v1018_v9 = vpop.permute.xlu0 %1017 }
 0x1e9   :  { %v1065_v58 = vmul.f32 %v1018_v9, %v676_v10  ;;  %v2025_v7 = vadd.f32 %v1073_v13, %v993_v44 }
 0x1eb   :  { %v2028_v21 = vadd.f32 %v1065_v58, %v1891_v23 }
 0x1ec   :  { %v934_v63 = vpop.permute.xlu1 %933 }
 0x1ed   :  { %v972_v36 = vmul.f32 %v934_v63, %v620_v16  ;;  %v572_v63 = vpop.f32.mrf.mxu2 }
 0x1ee   :  { %v573_v55 = vadd.f32 %v572_v63, %v1821_v59  ;;  %v493_v63 = vadd.f32 %v1853_v15, %v1865_v34  ;;  %v623_v15 = vadd.f32 %v1889_v18, %v1848_v11 }
 0x1ef   :  { %v988_v26 = vadd.f32 %v972_v36, %v892_v48  ;;  %v918_v47 = vpop.permute.xlu2 %917 }
 0x1f0   :  { %v2030_v17 = vpop.permute.xlu0 %1037  ;;  %v968_v10 = vmul.f32 %v918_v47, %v608_v43 }
 0x1f1   :  { %v2033_v56 = vadd.f32 %v1963_v45, %v988_v26  ;;  %v702_v26 = vpop.f32.mrf.mxu0 }
 0x1f5   :  { %v726_v28 = vpop.permute.xlu1 %725 }
 0x1f6   :  { %v791_v0 = vmul.f32 %v726_v28, %v475_v27  ;;  %v510_v27 = vpop.f32.mrf.mxu1  ;;  %v575_v28 = vpop.f32.mrf.mxu2 }
 0x1f7   :  { %v511_v47 = vadd.f32 %v510_v27, %v1865_v34 }
 0x1f8   :  { %v2040_v23 = vadd.f32 %v1973_v49, %v791_v0  ;;  %v761_v31 = vpop.permute.xlu2 %760  ;;  %v792_v49 = vmul.f32 %v731_v1, %v478_v35  ;;  %v640_v0 = vpop.f32.mrf.mxu3 }
 0x1f9   :  { %v906_v32 = vpop.permute.xlu0 %905  ;;  %v705_v35 = vpop.f32.mrf.mxu0 }
 0x1fa   :  { %v965_v48 = vmul.f32 %v906_v32, %v599_v42  ;;  %v882_v42 = vmul.f32 %v2009_v57, %v573_v55  ;;  %v576_v32 = vadd.f32 %v575_v28, %v1821_v59  ;;  %v703_v57 = vadd.f32 %v702_v26, %v1917_v60 }
 0x1fc   :  { %v2043_v3 = vadd.f32 %v965_v48, %v1950_v20 }
 0x1fd   :  { %v756_v33 = vpop.permute.xlu1 %755 }
 0x1fe   :  { %v797_v28 = vmul.f32 %v756_v33, %v493_v63 }
 0x201   :  { %v866_v45 = vpop.permute.xlu2 %865 }
 0x206   :  { %v822_v46 = vpop.permute.xlu1 %821 }
 0x207   :  { %v872_v54 = vmul.f32 %v822_v46, %v543_v37  ;;  %v638_v37 = vadd.f32 %v637_v50, %v1848_v11  ;;  %v802_v46 = vmul.f32 %v1986_v2, %v508_v52 }
 0x209   :  { %v888_v20 = vadd.f32 %v872_v54, %v792_v49  ;;  %v641_v49 = vadd.f32 %v640_v0, %v1848_v11  ;;  %v898_v54 = vadd.f32 %v882_v42, %v802_v46  ;;  %v2217_v0 = vld [vmem:[#allocation15_spill] sm:$0xff] }
 0x20a   :  { %v1014_v13 = vpop.permute.xlu2 %1013 }
 0x20b   :  { %v984_v44 = vadd.f32 %v968_v10, %v888_v20  ;;  %v1064_v9 = vmul.f32 %v1014_v13, %v673_v53  ;;  %v706_v53 = vadd.f32 %v705_v35, %v1917_v60  ;;  %v883_v10 = vmul.f32 %v866_v45, %v576_v32 }
 0x20c   :  { %v496_v20 = vadd.f32 %v1877_v6, %v1865_v34  ;;  %v558_v45 = vadd.f32 %v1868_v62, %v1821_v59 }
 0x20d   :  { %v2053_v16 = vadd.f32 %v1064_v9, %v984_v44  ;;  %v561_v44 = vadd.f32 %v1886_v24, %v1821_v59  ;;  %v978_v9 = vmul.f32 %v1983_v30, %v638_v37  ;;  %v1075_v50 = vmul.f32 %v2016_v14, %v706_v53 }
 0x20e   :  { %v1074_v24 = vmul.f32 %v1993_v8, %v703_v57  ;;  %v798_v30 = vmul.f32 %v761_v31, %v496_v20  ;;  %v626_v59 = vadd.f32 %v1906_v40, %v1848_v11  ;;  %v877_v34 = vmul.f32 %v1998_v29, %v558_v45  ;;  %v2216_v31 = vld [vmem:[#allocation13_spill] sm:$0xff]  ;;  %v2218_v40 = vld [vmem:[#allocation14_spill] sm:$0xff]  ;;  %v2220_v57 = vld [vmem:[#allocation12_spill] sm:$0xff] }
 0x20f   :  { %v786_v58 = vpop.permute.xlu1 %785  ;;  %v994_v6 = vadd.f32 %v978_v9, %v898_v54  ;;  %v670_v33 = vadd.f32 %v2216_v31, %v1917_v60  ;;  %v688_v35 = vadd.f32 %v2218_v40, %v1917_v60  ;;  %v973_v29 = vmul.f32 %v2004_v4, %v623_v15 }
 0x210   :  { %v803_v43 = vmul.f32 %v786_v58, %v511_v47  ;;  %v596_v58 = vadd.f32 %v1757_v39, %v1848_v11  ;;  %v605_v39 = vadd.f32 %v1798_v51, %v1848_v11  ;;  %v691_v51 = vadd.f32 %v2217_v0, %v1917_v60 }
 0x211   :  { %v1090_v8 = vadd.f32 %v1074_v24, %v994_v6  ;;  %v893_v42 = vadd.f32 %v877_v34, %v797_v28  ;;  %v602_v4 = vadd.f32 %v2220_v57, %v1848_v11  ;;  %v2221_v11 = vld [vmem:[#allocation11_spill] sm:$0xff] }
 0x212   :  { %v899_v41 = vadd.f32 %v883_v10, %v803_v43  ;;  %v2219_v43 = vld [vmem:[#allocation9_spill] sm:$0xff]  ;;  %v1070_v54 = vmul.f32 %v2030_v17, %v691_v51 }
 0x213   :  { %v942_v36 = vpop.permute.xlu2 %941  ;;  %v989_v53 = vadd.f32 %v973_v29, %v893_v42 }
 0x214   :  { %v974_v32 = vmul.f32 %v942_v36, %v626_v59 }
 0x218   :  { %v846_v1 = vpop.permute.xlu1 %845 }
 0x219   :  { %v878_v26 = vmul.f32 %v846_v1, %v561_v44 }
 0x21b   :  { %v894_v62 = vadd.f32 %v878_v26, %v798_v30 }
 0x21c   :  { %v1010_v48 = vpop.permute.xlu2 %1009 }
 0x21d   :  { %v990_v37 = vadd.f32 %v974_v32, %v894_v62 }
 0x221   :  { %v962_v13 = vpop.permute.xlu1 %961 }
 0x222   :  { %v979_v2 = vmul.f32 %v962_v13, %v641_v49  ;;  %v661_v49 = vadd.f32 %v2219_v43, %v1917_v60 }
 0x224   :  { %v995_v27 = vadd.f32 %v979_v2, %v899_v41 }
 0x225   :  { %v902_v55 = vpop.permute.xlu2 %901 }
 0x226   :  { %v1091_v52 = vadd.f32 %v1075_v50, %v995_v27  ;;  %v964_v47 = vmul.f32 %v902_v55, %v596_v58 }
 0x228   :  { %v980_v14 = vadd.f32 %v964_v47, %v1884_v22  ;;  %1102 = vmatpush.msra.mxu1 %v1091_v52  ;;  %v1063_v22 = vmul.f32 %v1010_v48, %v670_v33  ;;  %v1069_v48 = vmul.f32 %v2014_v38, %v688_v35 }
 0x229   :  { %v914_v1 = vpop.permute.xlu1 %913 }
 0x22a   :  { %v967_v18 = vmul.f32 %v914_v1, %v605_v39  ;;  %1103 = vmatpush.msra.mxu1 %v1090_v8  ;;  %v1085_v9 = vadd.f32 %v1069_v48, %v989_v53 }
 0x22c   :  { %v983_v46 = vadd.f32 %v967_v18, %v2040_v23  ;;  %1104 = vmatpush.msra.mxu1 %v2025_v7  ;;  %v1086_v23 = vadd.f32 %v1070_v54, %v990_v37 }
 0x22e   :  { %v998_v36 = vpop.permute.xlu2 %997  ;;  %1105 = vmatpush.msra.mxu1 %v1977_v61  ;;  %v1079_v10 = vadd.f32 %v1063_v22, %v983_v46  ;;  %v667_v61 = vadd.f32 %v2221_v11, %v1917_v60 }
 0x22f   :  { %v1060_v20 = vmul.f32 %v998_v36, %v661_v49 }
 0x230   :  { %1106 = vmatpush.msra.mxu1 %v1932_v19 }
 0x231   :  { %v1076_v7 = vadd.f32 %v1060_v20, %v980_v14  ;;  %v910_v13 = vpop.permute.xlu1 %909 }
 0x232   :  { %v966_v44 = vmul.f32 %v910_v13, %v602_v4  ;;  %1107 = vmatpush.msra.mxu1 %v1086_v23 }
 0x234   :  { %v982_v17 = vadd.f32 %v966_v44, %v2007_v25  ;;  %1108 = vmatpush.msra.mxu1 %v1085_v9  ;;  %v2222_v25 = vld [vmem:[#allocation10_spill] sm:$0xff] }
 0x235   :  { %v664_v2 = vadd.f32 %v2222_v25, %v1917_v60 }
 0x236   :  { %1109 = vmatpush.msra.mxu1 %v2033_v56 }
 0x238   :  { %1110 = vmatpush.msra.mxu1 %v1996_v12  ;;  %v2223_v12 = vlaneseq }
 0x23a   :  { %v1006_v38 = vpop.permute.xlu1 %1005  ;;  %1111 = vmatpush.msra.mxu1 %v1940_v5  ;;  %v1096_v63 = vshrl.u32 %v2223_v12, 7  ;;  %v1406_v5 = vld [vmem:[%s110_s30] ss:$0 sm:$0xff] }
 0x23b   :  { %v1062_v19 = vmul.f32 %v1006_v38, %v667_v61 }
 0x23c   :  { %1112 = vmatpush.msra.mxu1 %v2028_v21  ;;  %vm1098_vm0 = vcmp.eq.s32.totalorder %v1096_v63, %v1406_v5  ;;  %v1441_v21 = vmov 1.0  }
 0x23d   :  { %v1078_v41 = vadd.f32 %v1062_v19, %v982_v17 }
 0x23e   :  { %1113 = vmatpush.msra.mxu1 %v2053_v16  ;;  %v1101_v16 = vld [vmem:[#allocation2] sm:$0xff] }
 0x240   :  { %1114 = vmatpush.msra.mxu1 %v1079_v10 }
 0x242   :  { %v1002_v58 = vpop.permute.xlu1 %1001  ;;  %1115 = vmatpush.msra.mxu1 %v1078_v41 }
 0x243   :  { %v1061_v56 = vmul.f32 %v1002_v58, %v664_v2 }
 0x245   :  { %v1077_v45 = vadd.f32 %v1061_v56, %v2043_v3 }
 0x247   :  { %1116 = vmatpush.msra.mxu1 %v1077_v45 }
 0x249   :  { %1117 = vmatpush.msra.mxu1 %v1076_v7 }
 0x24a   :  { %1346 = vmatmul.msk.f32.vlgmr.msra.gmra.mxu1 %vm1098_vm0, %v1441_v21 }
 0x2c7   :  { %v1119_v6 = vpop.f32.mrf.mxu1 }
 0x2c8   :  { %v1122_v60 = vadd.f32 %v1119_v6, %v1101_v16 }
 0x2ca   :  { %1123 = vst [vmem:[#allocation2] sm:$0xff] %v1122_v60 }
 0x2cb PF:  { %v1131_v50 = vld [vmem:[%s2191_s8] sm:$0xf]  ;;  %vm1136_vm4 = vcmask 1043456   ;;  %vm1132_vm5 = vcmask 31744   ;;  %v1182_v3 = vld [vmem:[%s2193_s10 + $0x78] sm:$0xff]  ;;  %v1181_v27 = vld [vmem:[%s2193_s10 + $0x70] sm:$0xff] }
 0x2cc   :  { %v1129_v26 = vld [vmem:[%s2185_s2] sm:$0xff]  ;;  %1347 = vmatpush.msk.msra.mxu0 %vm1136_vm4, %v1131_v50  ;;  %1187 = vmatpush.msra.mxu1 %v1182_v3  ;;  %v1180_v24 = vld [vmem:[%s2193_s10 + $0x68] sm:$0xff]  ;;  %v1178_v30 = vld [vmem:[%s2193_s10 + $0x58] sm:$0xff]  ;;  %s1442_s18 = smov [#allocation6]   ;;  %s1215_s21 = sshll.u32 %s2195_s12, 4  ;;  %s1216_s21 = int_to_ptr.hbm [resolvable:$true] %s1215_s21 }
 0x2cd   :  { %1348 = vmatmul.msk.f32.vlgmr.msra.gmra.mxu0 %vm1132_vm5, %v1129_v26  ;;  %v1179_v55 = vld [vmem:[%s2193_s10 + $0x60] sm:$0xff]  ;;  %v1177_v28 = vld [vmem:[%s2193_s10 + $0x50] sm:$0xff]  ;;  %v1176_v52 = vld [vmem:[%s2193_s10 + $0x48] sm:$0xff]  ;;  %s1213_s19 = sshll.u32 %s1442_s18, 4  ;;  %s1214_s19 = int_to_ptr.vmem [resolvable:$true] %s1213_s19 }
 0x2ce   :  { %1188 = vmatpush.msra.mxu1 %v1181_v27  ;;  %v1175_v47 = vld [vmem:[%s2193_s10 + $0x40] sm:$0xff]  ;;  %v1174_v39 = vld [vmem:[%s2193_s10 + $0x38] sm:$0xff]  ;;  %v1173_v15 = vld [vmem:[%s2193_s10 + $0x30] sm:$0xff] }
 0x2cf   :  { %v1172_v59 = vld [vmem:[%s2193_s10 + $0x28] sm:$0xff]  ;;  %v1171_v34 = vld [vmem:[%s2193_s10 + $0x20] sm:$0xff]  ;;  %v1170_v62 = vld [vmem:[%s2193_s10 + $0x18] sm:$0xff] }
 0x2d0   :  { %1189 = vmatpush.msra.mxu1 %v1180_v24  ;;  %v1169_v14 = vld [vmem:[%s2193_s10 + $0x10] sm:$0xff]  ;;  %v1168_v8 = vld [vmem:[%s2193_s10 + $0x8] sm:$0xff]  ;;  %v1167_v31 = vld [vmem:[%s2193_s10] sm:$0xff] }
 0x2d1   :  { %v1130_v33 = vld [vmem:[#allocation2] sm:$0xff]  ;;  %v1407_v1 = vld [vmem:[%s2192_s9] ss:$0 sm:$0xff] }
 0x2d2   :  { %1190 = vmatpush.msra.mxu1 %v1179_v55  ;;  %v1408_v18 = vld [vmem:[%s2194_s11] ss:$0 sm:$0xff] }
 0x2d4   :  { %1191 = vmatpush.msra.mxu1 %v1178_v30 }
 0x2d6   :  { %1192 = vmatpush.msra.mxu1 %v1177_v28 }
 0x2d8   :  { %1193 = vmatpush.msra.mxu1 %v1176_v52 }
 0x2da   :  { %1194 = vmatpush.msra.mxu1 %v1175_v47 }
 0x2dc   :  { %1195 = vmatpush.msra.mxu1 %v1174_v39 }
 0x2de   :  { %1196 = vmatpush.msra.mxu1 %v1173_v15 }
 0x2e0   :  { %1197 = vmatpush.msra.mxu1 %v1172_v59 }
 0x2e2   :  { %1198 = vmatpush.msra.mxu1 %v1171_v34 }
 0x2e4   :  { %1199 = vmatpush.msra.mxu1 %v1170_v62 }
 0x2e6   :  { %1200 = vmatpush.msra.mxu1 %v1169_v14 }
 0x2e8   :  { %1201 = vmatpush.msra.mxu1 %v1168_v8 }
 0x2ea   :  { %1202 = vmatpush.msra.mxu1 %v1167_v31 }
 0x34a   :  { %v1157_v0 = vpop.f32.mrf.mxu0 }
 0x34b   :  { %v1160_v51 = vadd.f32 %v1157_v0, %v1130_v33 }
 0x34d   :  { %v1165_v42 = vadd.f32 %v1407_v1, %v1160_v51 }
 0x34f   :  { %v1166_v32 = vmax.f32 %v1165_v42, 0.0 }
 0x351   :  { %1203 = vmatmul.f32.vlgmr.msra.gmra.mxu1 %v1166_v32 }
 0x3ce   :  { %v1204_v40 = vpop.f32.mrf.mxu1 }
 0x3cf   :  { %v1205_v35 = vadd.f32 %v1408_v18, %v1204_v40 }
 0x3d1   :  { %1207 = vst [vmem:[#allocation6] sm:$0xff] %v1205_v35 }
 0x3d2   :  { %1218 = dma.vmem_to_hbm [thread:$0]  %s1214_s19, 128, %s1216_s21, [#allocation7]  }
 0x3d3   :  { %1433 = dma.done.wait [#allocation7], 128  }
 0x3d4   :  { %1434 = vsyncadd [#allocation7], 4294967168 }
 0x3d5   :  { %1223 = vsyncpa [#allocation7], 1 }

</bundles_post_ra>
